<compile_context>
chip_gen: v7x
topology: tpu7x:2x2x1
jax: 0.10.0
libtpu: 0.0.40
codegen_flags: <defaults>
</compile_context>

<pallas_src>
import jax
import jax.numpy as jnp
import numpy as np
from jax.experimental import pallas as pl
from jax.experimental.pallas import tpu as pltpu

_EPSS = 1e-12   # module's self.epss


# ----------------------------------------------------------------------------
# Host-side constant builders (shape-only, numpy, built at trace time, f64).
# ----------------------------------------------------------------------------
def _box_matrices(h, w, r):
    def band(n):
        idx = np.arange(n)
        return (np.abs(idx[:, None] - idx[None, :]) <= r).astype(np.float64)

    def counts(n):
        idx = np.arange(n)
        return (np.minimum(idx + r, n - 1) - np.maximum(idx - r, 0) + 1).astype(np.float64)

    bh_n = band(h) / counts(h)[:, None]       # (h,h): mean box along H (left multiply)
    bw_n = band(w) / counts(w)[None, :]       # (w,w): mean box along W (right multiply)
    nmap = np.outer(counts(h), counts(w))     # == boxfilter(ones)
    return bh_n, bw_n, nmap


def _interp_matrix(dst, src):
    """1-D bilinear interpolation matrix, align_corners=True:  out = M @ in."""
    m = np.zeros((dst, src), np.float64)
    if src == 1:
        m[:, 0] = 1.0
        return m
    if dst == 1:
        m[0, 0] = 1.0
        return m
    scale = (src - 1) / (dst - 1)
    for i in range(dst):
        pos = i * scale
        i0 = min(int(np.floor(pos)), src - 2)
        frac = pos - i0
        m[i, i0] += 1.0 - frac
        m[i, i0 + 1] += frac
    return m


def _fast_recip(x):
    """EUP approx reciprocal + one Newton-Raphson step (~full f32 accuracy)."""
    r = pl.reciprocal(x, approx=True)
    return r * (2.0 - x * r)


# ----------------------------------------------------------------------------
# Pallas kernel
# ----------------------------------------------------------------------------
def _make_kernel(cb, h, w, hh, wh, eps):
    def kernel(lr_x_ref, lr_y_ref, l_a_ref, hr_x_ref,
               nmap_t_ref, bwn_ref, bhn_ref, lh_ref, rw_ref, out_ref):
        a = jnp.abs(l_a_ref[0]) + _EPSS          # (cb, h, w)
        x = lr_x_ref[0]
        y = lr_y_ref[0]
        ax = a * x
        ay = a * y
        a2x = a * ax

        # 6 statistics x cb channels stacked on the leading (un-tiled) axis.
        stats = jnp.concatenate([a, ax, ay, a2x, a2x * y, a2x * x], axis=0)  # (6cb,h,w)

        # W mean-box pass: one big matmul (M = 6*cb*h), no structural zeros.
        statsw = jnp.dot(stats.reshape(6 * cb * h, w), bwn_ref[...],
                         preferred_element_type=jnp.float32).reshape(6 * cb, h, w)

        # H mean-box pass: batched matmul (batch = 6*cb), ideal MAC count.
        bh_b = jnp.broadcast_to(bhn_ref[...][None], (6 * cb, h, h))
        m = jnp.einsum('gij,gjw->giw', bh_b, statsw,
                       preferred_element_type=jnp.float32)                   # (6cb,h,w)

        mean_a    = m[0 * cb:1 * cb]
        mean_ax   = m[1 * cb:2 * cb]
        mean_ay   = m[2 * cb:3 * cb]
        mean_a2x  = m[3 * cb:4 * cb]
        mean_a2xy = m[4 * cb:5 * cb]
        mean_a2x2 = m[5 * cb:6 * cb]

        ntax = nmap_t_ref[...][None] * mean_a2x          # == N * mean_tax
        temp = jnp.abs(mean_a2x2 - ntax * mean_ax)
        A = (mean_a2xy - ntax * mean_ay) * _fast_recip(temp + eps)
        b = (mean_ay - A * mean_ax) * _fast_recip(mean_a)

        # Second mean-box pass + align_corners bilinear upsample, fused into the
        # combined matrices rw = Bw_n @ Uw^T  (w,wh) and lh = Uh @ Bh_n  (hh,h).
        ab = jnp.concatenate([A, b], axis=0)                                 # (2cb,h,w)
        abw = jnp.dot(ab.reshape(2 * cb * h, w), rw_ref[...],
                      preferred_element_type=jnp.float32).reshape(2 * cb, h, wh)
        lh_b = jnp.broadcast_to(lh_ref[...][None], (2 * cb, hh, h))
        up = jnp.einsum('gij,gjw->giw', lh_b, abw,
                        preferred_element_type=jnp.float32)                  # (2cb,hh,wh)

        out_ref[0] = up[0:cb] * hr_x_ref[0] + up[cb:2 * cb]

    return kernel


# ----------------------------------------------------------------------------
# Wrapper
# ----------------------------------------------------------------------------
def fast_guided_filter_attention(lr_x, lr_y, hr_x, l_a, *, r, eps=1e-8):
    lr_x = lr_x.astype(jnp.float32)
    lr_y = lr_y.astype(jnp.float32)
    hr_x = hr_x.astype(jnp.float32)
    l_a = l_a.astype(jnp.float32)

    n, c, h, w = lr_x.shape
    nh_, ch_, hh, wh = hr_x.shape
    assert lr_y.shape == (n, c, h, w) and l_a.shape == (n, c, h, w)
    assert nh_ == n and ch_ == c
    assert h > 2 * r + 1 and w > 2 * r + 1

    # --- host-side constants (f64 build, f32 on device) -----------------------
    bh_n, bw_n, nmap_np = _box_matrices(h, w, r)
    uh = _interp_matrix(hh, h)                   # (hh, h)
    uw = _interp_matrix(wh, w)                   # (wh, w)
    lh_np = (uh @ bh_n).astype(np.float32)       # fused H box + H upsample  (hh, h)
    rw_np = (bw_n @ uw.T).astype(np.float32)     # fused W box + W upsample  (w, wh)

    bwn = jnp.asarray(bw_n.astype(np.float32))   # (w, w)
    bhn = jnp.asarray(bh_n.astype(np.float32))   # (h, h)
    lh_j = jnp.asarray(lh_np)                    # (hh, h)
    rw_j = jnp.asarray(rw_np)                    # (w, wh)

    # Global attention normaliser (sum over the WHOLE batch, as in the module),
    # folded into the "N / t_all" map so no scalar is read inside the kernel.
    t_all = jnp.sum(jnp.abs(l_a)) + jnp.float32(_EPSS * l_a.size)
    nmap_t = jnp.asarray(nmap_np.astype(np.float32)) / t_all    # (h, w)

    # --- per-generation VMEM budget + channel-block tiling --------------------
    try:
        cap = int(getattr(pltpu.get_tpu_info(), "vmem_capacity_bytes", 0)) or (64 << 20)
    except Exception:
        cap = 64 << 20   # conservative fallback (v7x-sized)

    def step_bytes(cb_):
        lr_blk = 3 * cb_ * h * w                     # lr_x, lr_y, l_a blocks
        hr_blk = 2 * cb_ * hh * wh                   # hr_x block + out block
        consts = h * h + w * w + h * w + hh * h + w * wh
        inter = (16 * 6 * cb_ * h * w                # stats / filtered stats / temps
                 + 8 * cb_ * h * h                   # broadcast Bh for both passes
                 + 2 * cb_ * hh * h                  # broadcast lh
                 + 2 * cb_ * h * wh + 4 * cb_ * hh * wh)
        return 4 * (2 * (lr_blk + hr_blk) + 2 * consts + inter)

    cb = c
    if n == 1 and c > 1:
        # keep both v7x TensorCores busy when the batch axis alone cannot
        for cand in range(c // 2, 0, -1):
            if c % cand == 0:
                cb = cand
                break
    while step_bytes(cb) > int(cap * 0.7) and cb % 2 == 0 and cb > 1:
        cb //= 2

    vmem_limit = int(min(max(step_bytes(cb) * 3 // 2, 32 << 20), int(cap * 0.9)))

    grid = (n, c // cb)

    def lr_spec():
        return pl.BlockSpec((1, cb, h, w), lambda i, j: (i, j, 0, 0))

    hr_spec = pl.BlockSpec((1, cb, hh, wh), lambda i, j: (i, j, 0, 0))
    out_spec = pl.BlockSpec((1, cb, hh, wh), lambda i, j: (i, j, 0, 0))

    def const_spec(arr):
        return pl.BlockSpec(arr.shape, lambda i, j: (0, 0))

    consts = (nmap_t, bwn, bhn, lh_j, rw_j)
    kernel = _make_kernel(cb, h, w, hh, wh, float(eps))

    out = pl.pallas_call(
        kernel,
        out_shape=jax.ShapeDtypeStruct((n, c, hh, wh), jnp.float32),
        grid_spec=pltpu.PrefetchScalarGridSpec(
            num_scalar_prefetch=0,
            grid=grid,
            in_specs=[lr_spec(), lr_spec(), lr_spec(), hr_spec]
                     + [const_spec(a) for a in consts],
            out_specs=out_spec,
        ),
        compiler_params=pltpu.CompilerParams(
            dimension_semantics=("parallel", "parallel"),
            vmem_limit_bytes=vmem_limit,
        ),
    )(lr_x, lr_y, l_a, hr_x, *consts)
    return out


# ----------------------------------------------------------------------------
# Pure-JAX (XLA) reference mirroring the PyTorch code, for validation.
# ----------------------------------------------------------------------------
def _boxfilter_ref(x, r):
    cs = jnp.cumsum(x, axis=2)
    left = cs[:, :, r:2 * r + 1]
    middle = cs[:, :, 2 * r + 1:] - cs[:, :, :-2 * r - 1]
    right = cs[:, :, -1:] - cs[:, :, -2 * r - 1:-r - 1]
    x = jnp.concatenate([left, middle, right], axis=2)
    cs = jnp.cumsum(x, axis=3)
    left = cs[:, :, :, r:2 * r + 1]
    middle = cs[:, :, :, 2 * r + 1:] - cs[:, :, :, :-2 * r - 1]
    right = cs[:, :, :, -1:] - cs[:, :, :, -2 * r - 1:-r - 1]
    return jnp.concatenate([left, middle, right], axis=3)


def _bilinear_align_corners_ref(img, out_h, out_w):
    _, _, h, w = img.shape

    def grid(dst, src):
        if dst == 1:
            return jnp.zeros((dst,), jnp.float32)
        return jnp.arange(dst, dtype=jnp.float32) * ((src - 1) / (dst - 1))

    ys = grid(out_h, h)
    xs = grid(out_w, w)
    y0 = jnp.clip(jnp.floor(ys), 0, max(h - 2, 0)).astype(jnp.int32)
    x0 = jnp.clip(jnp.floor(xs), 0, max(w - 2, 0)).astype(jnp.int32)
    wy = (ys - y0.astype(jnp.float32))[None, None, :, None]
    wx = (xs - x0.astype(jnp.float32))[None, None, None, :]
    y1 = jnp.minimum(y0 + 1, h - 1)
    x1 = jnp.minimum(x0 + 1, w - 1)
    r0 = jnp.take(img, y0, axis=2)
    r1 = jnp.take(img, y1, axis=2)
    rows = r0 * (1.0 - wy) + r1 * wy
    c0 = jnp.take(rows, x0, axis=3)
    c1 = jnp.take(rows, x1, axis=3)
    return c0 * (1.0 - wx) + c1 * wx


def reference_forward(lr_x, lr_y, hr_x, l_a, *, r, eps=1e-8):
    lr_x = lr_x.astype(jnp.float32)
    lr_y = lr_y.astype(jnp.float32)
    hr_x = hr_x.astype(jnp.float32)
    l_a = l_a.astype(jnp.float32)
    _, _, h, w = lr_x.shape
    hh, wh = hr_x.shape[2], hr_x.shape[3]

    nbox = _boxfilter_ref(jnp.ones((1, 1, h, w), jnp.float32), r)
    la = jnp.abs(l_a) + _EPSS
    t_all = jnp.sum(la)
    lt = la / t_all
    mean_a = _boxfilter_ref(la, r) / nbox
    mean_a2xy = _boxfilter_ref(la * la * lr_x * lr_y, r) / nbox
    mean_tax = _boxfilter_ref(lt * la * lr_x, r) / nbox
    mean_ay = _boxfilter_ref(la * lr_y, r) / nbox
    mean_a2x2 = _boxfilter_ref(la * la * lr_x * lr_x, r) / nbox
    mean_ax = _boxfilter_ref(la * lr_x, r) / nbox
    temp = jnp.abs(mean_a2x2 - nbox * mean_tax * mean_ax)
    A = (mean_a2xy - nbox * mean_tax * mean_ay) / (temp + eps)
    b = (mean_ay - A * mean_ax) / mean_a
    A = _boxfilter_ref(A, r) / nbox
    b = _boxfilter_ref(b, r) / nbox
    mean_A = _bilinear_align_corners_ref(A, hh, wh)
    mean_b = _bilinear_align_corners_ref(b, hh, wh)
    return mean_A * hr_x + mean_b


if __name__ == "__main__":
    key = jax.random.PRNGKey(0)
    k1, k2, k3, k4 = jax.random.split(key, 4)

    N, C = 2, 4
    H_LR = W_LR = 16
    H_HR = W_HR = 32
    R = 2
    EPS = 1e-8

    lr_x = jax.random.normal(k1, (N, C, H_LR, W_LR), jnp.float32)
    lr_y = jax.random.normal(k2, (N, C, H_LR, W_LR), jnp.float32)
    hr_x = jax.random.normal(k3, (N, C, H_HR, W_HR), jnp.float32)
    l_a = jax.random.uniform(k4, (N, C, H_LR, W_LR), jnp.float32, 0.1, 1.0)

    fwd = jax.jit(lambda a, b, cc, d: fast_guided_filter_attention(a, b, cc, d, r=R, eps=EPS))
    out = jax.block_until_ready(fwd(lr_x, lr_y, hr_x, l_a))
    assert out.shape == (N, C, H_HR, W_HR)

    ref = reference_forward(lr_x, lr_y, hr_x, l_a, r=R, eps=EPS)
    np.testing.assert_allclose(np.asarray(out), np.asarray(ref), rtol=5e-3, atol=5e-3)

    print("KERNEL_OK")
</pallas_src>

<mosaic_0001>
module attributes {stable_mosaic.version = 11 : i64} {
  func.func @kernel(%arg0: i32, %arg1: i32, %arg2: memref<1x4x16x16xf32, #tpu.memory_space<vmem>>, %arg3: memref<1x4x16x16xf32, #tpu.memory_space<vmem>>, %arg4: memref<1x4x16x16xf32, #tpu.memory_space<vmem>>, %arg5: memref<1x4x32x32xf32, #tpu.memory_space<vmem>>, %arg6: memref<16x16xf32, #tpu.memory_space<vmem>>, %arg7: memref<16x16xf32, #tpu.memory_space<vmem>>, %arg8: memref<16x16xf32, #tpu.memory_space<vmem>>, %arg9: memref<32x16xf32, #tpu.memory_space<vmem>>, %arg10: memref<16x32xf32, #tpu.memory_space<vmem>>, %arg11: memref<1x4x32x32xf32, #tpu.memory_space<vmem>>) attributes {dimension_semantics = [#tpu.dimension_semantics<parallel>, #tpu.dimension_semantics<parallel>], iteration_bounds = array<i64: 2, 1>, scalar_prefetch = 0 : i64, scratch_operands = 0 : i64, tpu.core_type = #tpu.core_type<tc>, window_params = [{transform_indices = @transform_0, window_bounds = array<i64: 1, 4, 16, 16>}, {transform_indices = @transform_1, window_bounds = array<i64: 1, 4, 16, 16>}, {transform_indices = @transform_2, window_bounds = array<i64: 1, 4, 16, 16>}, {transform_indices = @transform_3, window_bounds = array<i64: 1, 4, 32, 32>}, {pipeline_mode = #tpu.pipeline_mode<synchronous>, transform_indices = @transform_4, window_bounds = array<i64: 16, 16>}, {pipeline_mode = #tpu.pipeline_mode<synchronous>, transform_indices = @transform_5, window_bounds = array<i64: 16, 16>}, {pipeline_mode = #tpu.pipeline_mode<synchronous>, transform_indices = @transform_6, window_bounds = array<i64: 16, 16>}, {pipeline_mode = #tpu.pipeline_mode<synchronous>, transform_indices = @transform_7, window_bounds = array<i64: 32, 16>}, {pipeline_mode = #tpu.pipeline_mode<synchronous>, transform_indices = @transform_8, window_bounds = array<i64: 16, 32>}, {transform_indices = @transform_9, window_bounds = array<i64: 1, 4, 32, 32>}]} {
    %c0 = arith.constant 0 : index
    %c0_0 = arith.constant 0 : index
    %c0_1 = arith.constant 0 : index
    %c0_2 = arith.constant 0 : index
    %0 = vector.load %arg4[%c0, %c0_0, %c0_1, %c0_2] : memref<1x4x16x16xf32, #tpu.memory_space<vmem>>, vector<1x4x16x16xf32>
    %1 = vector.shape_cast %0 : vector<1x4x16x16xf32> to vector<4x16x16xf32>
    %2 = math.absf %1 : vector<4x16x16xf32>
    %cst = arith.constant 9.99999996E-13 : f32
    %3 = vector.broadcast %cst : f32 to vector<4x16x16xf32>
    %4 = arith.addf %2, %3 : vector<4x16x16xf32>
    %c0_3 = arith.constant 0 : index
    %c0_4 = arith.constant 0 : index
    %c0_5 = arith.constant 0 : index
    %c0_6 = arith.constant 0 : index
    %5 = vector.load %arg2[%c0_3, %c0_4, %c0_5, %c0_6] : memref<1x4x16x16xf32, #tpu.memory_space<vmem>>, vector<1x4x16x16xf32>
    %6 = vector.shape_cast %5 : vector<1x4x16x16xf32> to vector<4x16x16xf32>
    %c0_7 = arith.constant 0 : index
    %c0_8 = arith.constant 0 : index
    %c0_9 = arith.constant 0 : index
    %c0_10 = arith.constant 0 : index
    %7 = vector.load %arg3[%c0_7, %c0_8, %c0_9, %c0_10] : memref<1x4x16x16xf32, #tpu.memory_space<vmem>>, vector<1x4x16x16xf32>
    %8 = vector.shape_cast %7 : vector<1x4x16x16xf32> to vector<4x16x16xf32>
    %9 = arith.mulf %4, %6 : vector<4x16x16xf32>
    %10 = arith.mulf %4, %8 : vector<4x16x16xf32>
    %11 = arith.mulf %4, %9 : vector<4x16x16xf32>
    %12 = arith.mulf %11, %8 : vector<4x16x16xf32>
    %13 = arith.mulf %11, %6 : vector<4x16x16xf32>
    %14 = tpu.concatenate %4, %9, %10, %11, %12, %13 in 0 : vector<4x16x16xf32>, vector<4x16x16xf32>, vector<4x16x16xf32>, vector<4x16x16xf32>, vector<4x16x16xf32>, vector<4x16x16xf32> -> vector<24x16x16xf32>
    %15 = vector.shape_cast %14 : vector<24x16x16xf32> to vector<384x16xf32>
    %c0_11 = arith.constant 0 : index
    %c0_12 = arith.constant 0 : index
    %16 = vector.load %arg7[%c0_11, %c0_12] : memref<16x16xf32, #tpu.memory_space<vmem>>, vector<16x16xf32>
    %cst_13 = arith.constant dense<0.000000e+00> : vector<384x16xf32>
    %17 = tpu.matmul %15, %16, %cst_13 {dimension_numbers = #tpu.dot_dimension_numbers<[1], [0], [0], [1], [0, 0, 1, 1], [], []>} : vector<384x16xf32>, vector<16x16xf32>, vector<384x16xf32> -> vector<384x16xf32>
    %18 = vector.shape_cast %17 : vector<384x16xf32> to vector<24x16x16xf32>
    %c0_14 = arith.constant 0 : index
    %c0_15 = arith.constant 0 : index
    %19 = vector.load %arg8[%c0_14, %c0_15] : memref<16x16xf32, #tpu.memory_space<vmem>>, vector<16x16xf32>
    %20 = vector.shape_cast %19 : vector<16x16xf32> to vector<1x16x16xf32>
    %21 = vector.shape_cast %20 : vector<1x16x16xf32> to vector<1x16x16xf32>
    %22 = vector.broadcast %21 : vector<1x16x16xf32> to vector<24x16x16xf32>
    "tpu.trace_start"() <{level = 10 : i32, message = "gij,gjw->giw"}> : () -> ()
    %cst_16 = arith.constant dense<0.000000e+00> : vector<24x16x16xf32>
    %23 = tpu.matmul %22, %18, %cst_16 {dimension_numbers = #tpu.dot_dimension_numbers<[2], [1], [1], [2], [0, 0, 0, 1, 1, 2], [0], [0]>} : vector<24x16x16xf32>, vector<24x16x16xf32>, vector<24x16x16xf32> -> vector<24x16x16xf32>
    "tpu.trace_stop"() : () -> ()
    %24 = vector.extract_strided_slice %23 {offsets = [0, 0, 0], sizes = [4, 16, 16], strides = [1, 1, 1]} : vector<24x16x16xf32> to vector<4x16x16xf32>
    %25 = vector.extract_strided_slice %23 {offsets = [4, 0, 0], sizes = [4, 16, 16], strides = [1, 1, 1]} : vector<24x16x16xf32> to vector<4x16x16xf32>
    %26 = vector.extract_strided_slice %23 {offsets = [8, 0, 0], sizes = [4, 16, 16], strides = [1, 1, 1]} : vector<24x16x16xf32> to vector<4x16x16xf32>
    %27 = vector.extract_strided_slice %23 {offsets = [12, 0, 0], sizes = [4, 16, 16], strides = [1, 1, 1]} : vector<24x16x16xf32> to vector<4x16x16xf32>
    %28 = vector.extract_strided_slice %23 {offsets = [16, 0, 0], sizes = [4, 16, 16], strides = [1, 1, 1]} : vector<24x16x16xf32> to vector<4x16x16xf32>
    %29 = vector.extract_strided_slice %23 {offsets = [20, 0, 0], sizes = [4, 16, 16], strides = [1, 1, 1]} : vector<24x16x16xf32> to vector<4x16x16xf32>
    %c0_17 = arith.constant 0 : index
    %c0_18 = arith.constant 0 : index
    %30 = vector.load %arg6[%c0_17, %c0_18] : memref<16x16xf32, #tpu.memory_space<vmem>>, vector<16x16xf32>
    %31 = vector.shape_cast %30 : vector<16x16xf32> to vector<1x16x16xf32>
    %32 = vector.broadcast %31 : vector<1x16x16xf32> to vector<4x16x16xf32>
    %33 = arith.mulf %32, %27 : vector<4x16x16xf32>
    %34 = arith.mulf %33, %25 : vector<4x16x16xf32>
    %35 = arith.subf %29, %34 : vector<4x16x16xf32>
    %36 = math.absf %35 : vector<4x16x16xf32>
    %37 = arith.mulf %33, %26 : vector<4x16x16xf32>
    %38 = arith.subf %28, %37 : vector<4x16x16xf32>
    %cst_19 = arith.constant 9.99999993E-9 : f32
    %39 = vector.broadcast %cst_19 : f32 to vector<4x16x16xf32>
    %40 = arith.addf %36, %39 : vector<4x16x16xf32>
    %41 = tpu.reciprocal %40 {approx = true} : vector<4x16x16xf32> -> vector<4x16x16xf32>
    %42 = arith.mulf %40, %41 : vector<4x16x16xf32>
    %cst_20 = arith.constant 2.000000e+00 : f32
    %43 = vector.broadcast %cst_20 : f32 to vector<4x16x16xf32>
    %44 = arith.subf %43, %42 : vector<4x16x16xf32>
    %45 = arith.mulf %41, %44 : vector<4x16x16xf32>
    %46 = arith.mulf %38, %45 : vector<4x16x16xf32>
    %47 = arith.mulf %46, %25 : vector<4x16x16xf32>
    %48 = arith.subf %26, %47 : vector<4x16x16xf32>
    %49 = tpu.reciprocal %24 {approx = true} : vector<4x16x16xf32> -> vector<4x16x16xf32>
    %50 = arith.mulf %24, %49 : vector<4x16x16xf32>
    %cst_21 = arith.constant 2.000000e+00 : f32
    %51 = vector.broadcast %cst_21 : f32 to vector<4x16x16xf32>
    %52 = arith.subf %51, %50 : vector<4x16x16xf32>
    %53 = arith.mulf %49, %52 : vector<4x16x16xf32>
    %54 = arith.mulf %48, %53 : vector<4x16x16xf32>
    %55 = tpu.concatenate %46, %54 in 0 : vector<4x16x16xf32>, vector<4x16x16xf32> -> vector<8x16x16xf32>
    %56 = vector.shape_cast %55 : vector<8x16x16xf32> to vector<128x16xf32>
    %c0_22 = arith.constant 0 : index
    %c0_23 = arith.constant 0 : index
    %57 = vector.load %arg10[%c0_22, %c0_23] : memref<16x32xf32, #tpu.memory_space<vmem>>, vector<16x32xf32>
    %cst_24 = arith.constant dense<0.000000e+00> : vector<128x32xf32>
    %58 = tpu.matmul %56, %57, %cst_24 {dimension_numbers = #tpu.dot_dimension_numbers<[1], [0], [0], [1], [0, 0, 1, 1], [], []>} : vector<128x16xf32>, vector<16x32xf32>, vector<128x32xf32> -> vector<128x32xf32>
    %59 = vector.shape_cast %58 : vector<128x32xf32> to vector<8x16x32xf32>
    %c0_25 = arith.constant 0 : index
    %c0_26 = arith.constant 0 : index
    %60 = vector.load %arg9[%c0_25, %c0_26] : memref<32x16xf32, #tpu.memory_space<vmem>>, vector<32x16xf32>
    %61 = vector.shape_cast %60 : vector<32x16xf32> to vector<1x32x16xf32>
    %62 = vector.shape_cast %61 : vector<1x32x16xf32> to vector<1x32x16xf32>
    %63 = vector.broadcast %62 : vector<1x32x16xf32> to vector<8x32x16xf32>
    "tpu.trace_start"() <{level = 10 : i32, message = "gij,gjw->giw"}> : () -> ()
    %cst_27 = arith.constant dense<0.000000e+00> : vector<8x32x32xf32>
    %64 = tpu.matmul %63, %59, %cst_27 {dimension_numbers = #tpu.dot_dimension_numbers<[2], [1], [1], [2], [0, 0, 0, 1, 1, 2], [0], [0]>} : vector<8x32x16xf32>, vector<8x16x32xf32>, vector<8x32x32xf32> -> vector<8x32x32xf32>
    "tpu.trace_stop"() : () -> ()
    %65 = vector.extract_strided_slice %64 {offsets = [0, 0, 0], sizes = [4, 32, 32], strides = [1, 1, 1]} : vector<8x32x32xf32> to vector<4x32x32xf32>
    %c0_28 = arith.constant 0 : index
    %c0_29 = arith.constant 0 : index
    %c0_30 = arith.constant 0 : index
    %c0_31 = arith.constant 0 : index
    %66 = vector.load %arg5[%c0_28, %c0_29, %c0_30, %c0_31] : memref<1x4x32x32xf32, #tpu.memory_space<vmem>>, vector<1x4x32x32xf32>
    %67 = vector.shape_cast %66 : vector<1x4x32x32xf32> to vector<4x32x32xf32>
    %68 = arith.mulf %65, %67 : vector<4x32x32xf32>
    %69 = vector.extract_strided_slice %64 {offsets = [4, 0, 0], sizes = [4, 32, 32], strides = [1, 1, 1]} : vector<8x32x32xf32> to vector<4x32x32xf32>
    %70 = arith.addf %68, %69 : vector<4x32x32xf32>
    %c0_32 = arith.constant 0 : index
    %c0_33 = arith.constant 0 : index
    %c0_34 = arith.constant 0 : index
    %c0_35 = arith.constant 0 : index
    %71 = vector.load %arg11[%c0_32, %c0_33, %c0_34, %c0_35] : memref<1x4x32x32xf32, #tpu.memory_space<vmem>>, vector<1x4x32x32xf32>
    %72 = vector.shape_cast %71 : vector<1x4x32x32xf32> to vector<4x32x32xf32>
    %73 = vector.shape_cast %70 : vector<4x32x32xf32> to vector<1x4x32x32xf32>
    tpu.vector_store %arg11[%c0_32, %c0_33, %c0_34, %c0_35], %73 {strides = array<i32>} : memref<1x4x32x32xf32, #tpu.memory_space<vmem>>, vector<1x4x32x32xf32>,
    return
  }
  func.func @transform_0(%arg0: i32, %arg1: i32) -> (i32, i32, i32, i32) {
    %c0_i32 = arith.constant 0 : i32
    %c0_i32_0 = arith.constant 0 : i32
    %c0_i32_1 = arith.constant 0 : i32
    return %arg0, %arg1, %c0_i32, %c0_i32_0 : i32, i32, i32, i32
  }
  func.func @transform_1(%arg0: i32, %arg1: i32) -> (i32, i32, i32, i32) {
    %c0_i32 = arith.constant 0 : i32
    %c0_i32_0 = arith.constant 0 : i32
    %c0_i32_1 = arith.constant 0 : i32
    return %arg0, %arg1, %c0_i32, %c0_i32_0 : i32, i32, i32, i32
  }
  func.func @transform_2(%arg0: i32, %arg1: i32) -> (i32, i32, i32, i32) {
    %c0_i32 = arith.constant 0 : i32
    %c0_i32_0 = arith.constant 0 : i32
    %c0_i32_1 = arith.constant 0 : i32
    return %arg0, %arg1, %c0_i32, %c0_i32_0 : i32, i32, i32, i32
  }
  func.func @transform_3(%arg0: i32, %arg1: i32) -> (i32, i32, i32, i32) {
    %c0_i32 = arith.constant 0 : i32
    %c0_i32_0 = arith.constant 0 : i32
    %c0_i32_1 = arith.constant 0 : i32
    return %arg0, %arg1, %c0_i32, %c0_i32_0 : i32, i32, i32, i32
  }
  func.func @transform_4(%arg0: i32, %arg1: i32) -> (i32, i32) {
    %c0_i32 = arith.constant 0 : i32
    %c0_i32_0 = arith.constant 0 : i32
    %c0_i32_1 = arith.constant 0 : i32
    return %c0_i32, %c0_i32_0 : i32, i32
  }
  func.func @transform_5(%arg0: i32, %arg1: i32) -> (i32, i32) {
    %c0_i32 = arith.constant 0 : i32
    %c0_i32_0 = arith.constant 0 : i32
    %c0_i32_1 = arith.constant 0 : i32
    return %c0_i32, %c0_i32_0 : i32, i32
  }
  func.func @transform_6(%arg0: i32, %arg1: i32) -> (i32, i32) {
    %c0_i32 = arith.constant 0 : i32
    %c0_i32_0 = arith.constant 0 : i32
    %c0_i32_1 = arith.constant 0 : i32
    return %c0_i32, %c0_i32_0 : i32, i32
  }
  func.func @transform_7(%arg0: i32, %arg1: i32) -> (i32, i32) {
    %c0_i32 = arith.constant 0 : i32
    %c0_i32_0 = arith.constant 0 : i32
    %c0_i32_1 = arith.constant 0 : i32
    return %c0_i32, %c0_i32_0 : i32, i32
  }
  func.func @transform_8(%arg0: i32, %arg1: i32) -> (i32, i32) {
    %c0_i32 = arith.constant 0 : i32
    %c0_i32_0 = arith.constant 0 : i32
    %c0_i32_1 = arith.constant 0 : i32
    return %c0_i32, %c0_i32_0 : i32, i32
  }
  func.func @transform_9(%arg0: i32, %arg1: i32) -> (i32, i32, i32, i32) {
    %c0_i32 = arith.constant 0 : i32
    %c0_i32_0 = arith.constant 0 : i32
    %c0_i32_1 = arith.constant 0 : i32
    return %arg0, %arg1, %c0_i32, %c0_i32_0 : i32, i32, i32, i32
  }
}

</mosaic_0001>

<bundles_post_ra>
// kernel: _lambda_.1
= control target key start
LH: loop header
LB: loop body
LE: loop exit
PB: predicated region body
PF: predicated region fallthrough
CT: control target
= control target key end

     0   :  { %s6413_s0 = inlined_call_operand.hbm [shape: f32[2,4,16,16], index: 0, kind: input, shape index: {}]   ;;  %s6414_s1 = inlined_call_operand.hbm [shape: f32[2,4,16,16], index: 1, kind: input, shape index: {}]   ;;  %s6415_s2 = inlined_call_operand.vmem [shape: f32[2,4,16,16], index: 2, kind: input, shape index: {}]   ;;  %s6416_s3 = inlined_call_operand.hbm [shape: f32[2,4,32,32], index: 3, kind: input, shape index: {}]   ;;  %s6417_s4 = inlined_call_operand.vmem [shape: f32[16,16], index: 4, kind: input, shape index: {}]   ;;  %s6418_s5 = inlined_call_operand.hbm [shape: f32[16,16], index: 5, kind: input, shape index: {}]   ;;  %s6419_s6 = inlined_call_operand.hbm [shape: f32[16,16], index: 6, kind: input, shape index: {}]   ;;  %s6420_s7 = inlined_call_operand.vmem [shape: f32[32,16], index: 7, kind: input, shape index: {}]   ;;  %s6421_s8 = inlined_call_operand.vmem [shape: f32[16,32], index: 8, kind: input, shape index: {}]   ;;  %s6422_s9 = inlined_call_operand.hbm [shape: f32[2,4,32,32], index: 9, kind: output, shape index: {}]  }
   0x1   :  { %6457 = sst [smem:[#allocation28_spill]] %s6414_s1 }
   0x2   :  { %6458 = sst [smem:[#allocation29_spill]] %s6417_s4 }
   0x3   :  { %6459 = sst [smem:[#allocation30_spill]] %s6418_s5 }
   0x4   :  { %6460 = sst [smem:[#allocation31_spill]] %s6419_s6 }
   0x5   :  { %6461 = sst [smem:[#allocation32_spill]] %s6420_s7 }
   0x6   :  { %6462 = sst [smem:[#allocation33_spill]] %s6421_s8 }
   0x7   :  { %6463 = sst [smem:[#allocation34_spill]] %s6422_s9 }
   0x8   :  { %14 = vsyncpa [#allocation3], 0 }
   0x9   :  { %16 = vsyncpa [#allocation3 + $0x1], 0 }
   0xa   :  { %17 = vsyncpa [#allocation6], 0 }
   0xb   :  { %19 = vsyncpa [#allocation6 + $0x1], 0 }
   0xc   :  { %20 = vsyncpa [#allocation9], 0 }
   0xd   :  { %21 = vsyncpa [#allocation4], 0 }
   0xe   :  { %23 = vsyncpa [#allocation4 + $0x1], 0  ;;  %s5477_s30 = smov 0   ;;  %s5479_s10 = smov 0  }
   0xf   :  { %s5481_s11 = smov 0   ;;  %s5483_s12 = smov 0  }
  0x10   :  { %s5485_s13 = smov 0   ;;  %s5487_s14 = smov 0  }
  0x11 LB: > { %6464 = sst [smem:[#allocation16_spill]] %s5395_s30  ;;  %s5508_s15 = sadd.s32 4294967295, %s5415_s14   ;;  %s5415_s14 = sphi %s5487_s14, %s29_s14   ;;  %s5411_s13 = sphi %s5485_s13, %s6534_s13   ;;  %s5407_s12 = sphi %s5483_s12, %s6533_s12   ;;  %s5403_s11 = sphi %s5481_s11, %s6532_s11   ;;  %s5399_s10 = sphi %s5479_s10, %s6531_s10   ;;  %s5395_s30 = sphi %s5477_s30, %s6530_s30  }
  0x12   : > { %s4173_s16 = sadd.s32 4294967294, %s5415_s14   ;;  %p57_p0 = scmp.ne.s32.totalorder %s5403_s11, %s5399_s10 }
  0x13   : > { %p58_p1 = scmp.eq.s32.totalorder %s5415_s14, 0  ;;  %p63_p2 = scmp.ne.s32.totalorder %s5399_s10, %s5395_s30 }
  0x14   : > { %p6426_p3 = scmp.eq.s32.totalorder %s5508_s15, 0  ;;  %p278_p4 = scmp.eq.s32.totalorder %s5508_s15, 1 }
  0x15   : > { %p5519_p5 = por %p58_p1, %p57_p0  ;;  %p284_p6 = scmp.eq.s32.totalorder %s4173_s16, 1 }
  0x16   : > { %p5525_p7 = por %p6426_p3, %p63_p2  ;;  %p5529_p8 = por %p278_p4, %p57_p0 }
  0x17   : > { %p5533_p9 = por %p284_p6, %p63_p2  ;;  %p4174_p10 = scmp.ge.s32.totalorder %s5415_s14, 1 }
  0x18   : > { %s6466_s19 = scalar_select %p5525_p7, 1, 0 }
  0x19   : > { %s6467_s20 = scalar_select %p5529_p8, 1, 0 }
  0x1a   : > { %s6469_s21 = scalar_select %p5533_p9, 1, 0 }
  0x1b   : > { %6468 = sst [smem:[#allocation17_spill]] %s6467_s20  ;;  %p291_p11 = scmp.lt.s32.totalorder %s5415_s14, 3 }
  0x1c   : > { %6470 = sst [smem:[#allocation18_spill]] %s6469_s21  ;;  %s5417_s23 = smov [#allocation8]  }
  0x1d   : > { %p5539_p12 = pnand %p4174_p10, %p291_p11  ;;  %s306_s24 = sshll.u32 %s5417_s23, 4  ;;  %s5543_s24 = int_to_ptr.vmem [resolvable:$true] %s306_s24 }
  0x1e   : > { %s41_s26 = sadd.s32 1, %s5411_s13  ;;  %s5557_s27 = sand.u32 1, %s5403_s11  }
  0x1f   : > { %s6471_s22 = scalar_select %p5539_p12, 1, 0 }
  0x20   : > { %p5066_p13 = pneg %p5539_p12  ;;  %p5559_p4 = scmp.ge.s32.totalorder %s41_s26, 2 }
  0x21   : > { %s6474_s5 = sld [smem:[#allocation30_spill]] }
  0x22   : > { %p5551_p2 = pnand %p5066_p13, %p6426_p3 }
  0x24   : > { %s6472_s25 = scalar_select %p5551_p2, 1, 0 }
  0x25   : > { %p6441_p10 = pneg %p5551_p2 }
  0x27   : > { %s5179_s23 = scalar_lea.hbm %s6474_s5, 256 }
  0x28   : > { %p5180_p6 = scmp.ne.s32.totalorder %s6474_s5, %s5179_s23  ;;  %p5186_p0 = scmp.lt.u32.totalorder %s5179_s23, %s6474_s5 }
  0x2a   : > { %p5182_p11 = pnand %p6441_p10, %p5180_p6 }
  0x2c   : > { %p5183_p13 = pneg %p5182_p11 }
  0x2e   : > { %p5188_p3 = pnand %p5186_p0, %p5183_p13 }
  0x30   : > { %5191 = shalt.err (!%p5188_p3)
}
  0x31   : > { %s5192_s29 = scalar_lea.vmem %s5543_s24, 256  ;;  %p5200_p7 = scmp.lt.s32.totalorder %s5543_s24, %s5543_s24 }
  0x32   : > { %p5193_p1 = scmp.ne.s32.totalorder %s5543_s24, %s5192_s29  ;;  %p5201_p6 = scmp.lt.s32.totalorder %s5192_s29, %s5192_s29 }
  0x34   : > { %p5195_p9 = pnand %p5193_p1, %p6441_p10  ;;  %p5202_p11 = por %p5201_p6, %p5200_p7 }
  0x36   : > { %p5196_p8 = pneg %p5195_p9 }
  0x38   : > { %p5203_p12 = pnand %p5202_p11, %p5196_p8 }
  0x3a   : > { %5206 = shalt.err (!%p5203_p12)
}
  0x3b   : > { %s6435_s9 = smov 128   ;;  %s6437_s30 = smov 8  }
  0x3c   : > { %5069 = dma.hbm_to_vmem [thread:$0]  (!%p5551_p2), %s6474_s5, 256, %s5543_s24, [#allocation9], %s6435_s9, %s6435_s9, %s6437_s30  }
  0x3d   : > { %s6536_s26 = smov (%p5559_p4, %s41_s26), 0  ;;  %s6439_s16 = sshll.u32 %s5557_s27, 6 }
  0x3e   : > { %s6440_s23 = sshll.u32 %s5411_s13, 10  ;;  %s45_s29 = ssub.s32 %s5411_s13, %s6536_s26 }
  0x3f   : > { %p6475_p3 = scmp.lt.s32.totalorder %s5415_s14, 2  ;;  %p48_p8 = scmp.eq.s32.totalorder %s45_s29, 0 }
  0x40   : > { %s363_s7 = sand.u32 1, %s5415_s14   ;;  %s6477_s4 = sadd.s32 1, %s5403_s11 }
  0x41   : > { %p5605_p7 = pnand %p6475_p3, %p5519_p5  ;;  %s6478_s1 = sld [smem:[#allocation28_spill]] }
  0x42   : > { %s5613_s8 = scalar_select %p48_p8, %s5403_s11, %s6477_s4  }
  0x43   : > { %s6476_s20 = scalar_select %p5605_p7, 1, 0 }
  0x44   : > { %s367_s18 = scalar_lea.vmem [#allocation5], %s6439_s16  ;;  %s5420_s29 = smov [#allocation10]  }
  0x45   : > { %s377_s21 = sshll.u32 %s367_s18, 4  ;;  %s5626_s9 = sshll.u32 %s5420_s29, 4  ;;  %s5624_s21 = int_to_ptr.vmem [resolvable:$true] %s377_s21  ;;  %s320_s9 = int_to_ptr.vmem [resolvable:$true] %s5626_s9 }
  0x46   : > { %s5628_s4 = scalar_lea.sflag [#allocation6], %s363_s7  ;;  %p5634_p9 = pneg %p5605_p7 }
  0x47   : > { %s5620_s17 = scalar_lea.hbm %s6478_s1, %s6440_s23  ;;  %s5212_s16 = scalar_lea.hbm %s6478_s1, 2048 }
  0x48   : > { %s5207_s30 = scalar_lea.hbm %s5620_s17, 1024  ;;  %p5213_p1 = scmp.lt.u32.totalorder %s5620_s17, %s6478_s1 }
  0x49   : > { %p5208_p5 = scmp.ne.s32.totalorder %s5620_s17, %s5207_s30  ;;  %p5214_p4 = scmp.lt.u32.totalorder %s5212_s16, %s5207_s30 }
  0x4a   : > { %s6479_s24 = scalar_select %p5634_p9, 1, 0 }
  0x4b   : > { %p5210_p12 = pnand %p5634_p9, %p5208_p5  ;;  %p5215_p13 = por %p5214_p4, %p5213_p1 }
  0x4c   : > { %p5216_p6 = scmp.lt.u32.totalorder %s5207_s30, %s5620_s17 }
  0x4d   : > { %p5211_p0 = pneg %p5210_p12 }
  0x4e   : > { %p5217_p11 = por %p5216_p6, %p5215_p13 }
  0x50   : > { %p5218_p3 = pnand %p5217_p11, %p5211_p0 }
  0x52   : > { %5221 = shalt.err (!%p5218_p3)
}
  0x53   : > { %s5222_s7 = scalar_lea.vmem %s5624_s21, 1024  ;;  %s5421_s28 = smov [#allocation5]  }
  0x54   : > { %p5223_p8 = scmp.ne.s32.totalorder %s5624_s21, %s5222_s7  ;;  %s5227_s18 = sshll.u32 %s5421_s28, 4  ;;  %s5228_s18 = int_to_ptr.vmem [resolvable:$false] %s5227_s18 }
  0x55   : > { %s5229_s23 = scalar_lea.vmem %s5228_s18, 2048  ;;  %p5230_p10 = scmp.lt.s32.totalorder %s5624_s21, %s5228_s18 }
  0x56   : > { %p5225_p5 = pnand %p5223_p8, %p5634_p9  ;;  %p5231_p2 = scmp.lt.s32.totalorder %s5229_s23, %s5222_s7 }
  0x58   : > { %p5226_p12 = pneg %p5225_p5  ;;  %p5232_p1 = por %p5231_p2, %p5230_p10 }
  0x5a   : > { %p5233_p4 = pnand %p5232_p1, %p5226_p12 }
  0x5c   : > { %5236 = shalt.err (!%p5233_p4)
}
  0x5d   : > { %s6480_s30 = smov 8   ;;  %s6481_s16 = smov 128  }
  0x5e   : > { %5079 = dma.hbm_to_vmem [thread:$0]  (!%p5605_p7), %s5620_s17, 1024, %s5624_s21, %s5628_s4, %s6481_s16, %s6481_s16, %s6480_s30  }
  0x5f   : > { %s6482_s6 = sld [smem:[#allocation31_spill]]  ;;  %p6483_p10 = scmp.ne.s32.totalorder %s6472_s25, 0 }
  0x61   : > { %p6484_p0 = pneg %p6483_p10 }
  0x65   : > { %s5237_s18 = scalar_lea.hbm %s6482_s6, 256 }
  0x66   : > { %p5238_p2 = scmp.ne.s32.totalorder %s6482_s6, %s5237_s18  ;;  %p5244_p11 = scmp.lt.u32.totalorder %s5237_s18, %s6482_s6 }
  0x68   : > { %p5240_p13 = pnand %p5238_p2, %p6484_p0 }
  0x6a   : > { %p5241_p6 = pneg %p5240_p13 }
  0x6c   : > { %p5246_p3 = pnand %p5244_p11, %p5241_p6 }
  0x6e   : > { %5249 = shalt.err (!%p5246_p3)
}
  0x6f   : > { %s5250_s17 = scalar_lea.vmem %s320_s9, 256  ;;  %p6485_p5 = pmov %p6484_p0 }
  0x70   : > { %p5251_p8 = scmp.ne.s32.totalorder %s320_s9, %s5250_s17  ;;  %p5258_p4 = scmp.lt.s32.totalorder %s320_s9, %s320_s9 }
  0x71   : > { %p5259_p7 = scmp.lt.s32.totalorder %s5250_s17, %s5250_s17 }
  0x72   : > { %p5253_p12 = pnand %p5251_p8, %p6485_p5 }
  0x73   : > { %p5260_p9 = por %p5259_p7, %p5258_p4 }
  0x74   : > { %p5254_p1 = pneg %p5253_p12 }
  0x76   : > { %p5261_p0 = pnand %p5260_p9, %p5254_p1 }
  0x78   : > { %5264 = shalt.err (!%p5261_p0)
}
  0x79   : > { %5072 = dma.hbm_to_vmem [thread:$0]  (!%p6483_p10), %s6482_s6, 256, %s320_s9, [#allocation9], %s6481_s16, %s6481_s16, %s6480_s30  }
  0x7a   : > { %s6486_s21 = sshll.u32 %s5411_s13, 10  ;;  %s6487_s7 = sshll.u32 %s5557_s27, 6 }
  0x7b   : > { %s5690_s18 = scalar_lea.hbm %s6413_s0, %s6486_s21  ;;  %s343_s25 = scalar_lea.vmem [#allocation2], %s6487_s7 }
  0x7c   : > { %s353_s23 = sshll.u32 %s343_s25, 4  ;;  %s4184_s17 = sshll.u32 %s5557_s27, 7  ;;  %s5695_s23 = int_to_ptr.vmem [resolvable:$true] %s353_s23 }
  0x7d   : > { %s340_s1 = scalar_lea.sflag [#allocation3], %s5557_s27  ;;  %s5265_s5 = scalar_lea.hbm %s5690_s18, 1024 }
  0x7e   : > { %p5266_p7 = scmp.ne.s32.totalorder %s5690_s18, %s5265_s5  ;;  %p6488_p9 = scmp.ne.s32.totalorder %s6479_s24, 0 }
  0x7f   : > { %s5270_s21 = scalar_lea.hbm %s6413_s0, 2048  ;;  %p5271_p13 = scmp.lt.u32.totalorder %s5690_s18, %s6413_s0 }
  0x80   : > { %p5268_p2 = pnand %p5266_p7, %p6488_p9  ;;  %p5272_p6 = scmp.lt.u32.totalorder %s5270_s21, %s5265_s5 }
  0x81   : > { %p5274_p3 = scmp.lt.u32.totalorder %s5265_s5, %s5690_s18 }
  0x82   : > { %p5269_p10 = pneg %p5268_p2  ;;  %p5273_p11 = por %p5272_p6, %p5271_p13 }
  0x84   : > { %p5275_p8 = por %p5274_p3, %p5273_p11 }
  0x86   : > { %p5276_p5 = pnand %p5275_p8, %p5269_p10 }
  0x88   : > { %5279 = shalt.err (!%p5276_p5)
}
  0x89   : > { %s5280_s7 = scalar_lea.vmem %s5695_s23, 1024  ;;  %s5422_s25 = smov [#allocation2]  }
  0x8a   : > { %p5281_p12 = scmp.ne.s32.totalorder %s5695_s23, %s5280_s7  ;;  %s5285_s9 = sshll.u32 %s5422_s25, 4  ;;  %s5286_s9 = int_to_ptr.vmem [resolvable:$false] %s5285_s9 }
  0x8b   : > { %s5287_s6 = scalar_lea.vmem %s5286_s9, 2048  ;;  %p5288_p0 = scmp.lt.s32.totalorder %s5695_s23, %s5286_s9 }
  0x8c   : > { %p5283_p1 = pnand %p5281_p12, %p6488_p9  ;;  %p5289_p7 = scmp.lt.s32.totalorder %s5287_s6, %s5280_s7 }
  0x8e   : > { %p5284_p4 = pneg %p5283_p1  ;;  %p5290_p2 = por %p5289_p7, %p5288_p0 }
  0x90   : > { %p5291_p13 = pnand %p5290_p2, %p5284_p4 }
  0x92   : > { %5294 = shalt.err (!%p5291_p13)
}
  0x93   : > { %p6489_p10 = scmp.ne.s32.totalorder %s6476_s20, 0  ;;  %s4347_s5 = sshll.u32 %s5411_s13, 11 }
  0x94   : > { %s405_s29 = scalar_lea.vmem [#allocation7], %s4184_s17  ;;  %s5730_s25 = scalar_lea.hbm %s6416_s3, %s4347_s5 }
  0x95   : > { %5076 = dma.hbm_to_vmem [thread:$0]  (!%p6489_p10), %s5690_s18, 1024, %s5695_s23, %s340_s1, %s6481_s16, %s6481_s16, %s6480_s30  }
  0x96   : > { %s415_s21 = sshll.u32 %s405_s29, 4  ;;  %s5295_s9 = scalar_lea.hbm %s5730_s25, 2048  ;;  %s5732_s21 = int_to_ptr.vmem [resolvable:$true] %s415_s21 }
  0x97   : > { %p5296_p6 = scmp.ne.s32.totalorder %s5730_s25, %s5295_s9  ;;  %s5300_s23 = scalar_lea.hbm %s6416_s3, 4096 }
  0x98   : > { %p5301_p8 = scmp.lt.u32.totalorder %s5730_s25, %s6416_s3  ;;  %p5302_p5 = scmp.lt.u32.totalorder %s5300_s23, %s5295_s9 }
  0x99   : > { %p5298_p11 = pnand %p5296_p6, %p6488_p9  ;;  %p5304_p1 = scmp.lt.u32.totalorder %s5295_s9, %s5730_s25 }
  0x9a   : > { %p5303_p12 = por %p5302_p5, %p5301_p8 }
  0x9b   : > { %p5299_p3 = pneg %p5298_p11 }
  0x9c   : > { %p5305_p4 = por %p5304_p1, %p5303_p12 }
  0x9e   : > { %p5306_p0 = pnand %p5305_p4, %p5299_p3 }
  0xa0   : > { %5309 = shalt.err (!%p5306_p0)
}
  0xa1   : > { %s5310_s6 = scalar_lea.vmem %s5732_s21, 2048  ;;  %s5423_s5 = smov [#allocation7]  }
  0xa2   : > { %p5311_p7 = scmp.ne.s32.totalorder %s5732_s21, %s5310_s6  ;;  %s5315_s29 = sshll.u32 %s5423_s5, 4  ;;  %s5316_s29 = int_to_ptr.vmem [resolvable:$false] %s5315_s29 }
  0xa3   : > { %s5317_s28 = scalar_lea.vmem %s5316_s29, 4096  ;;  %p5318_p6 = scmp.lt.s32.totalorder %s5732_s21, %s5316_s29 }
  0xa4   : > { %p5313_p2 = pnand %p5311_p7, %p6488_p9  ;;  %p5319_p11 = scmp.lt.s32.totalorder %s5317_s28, %s5310_s6 }
  0xa6   : > { %p5314_p13 = pneg %p5313_p2  ;;  %p5320_p8 = por %p5319_p11, %p5318_p6 }
  0xa8   : > { %p5321_p5 = pnand %p5320_p8, %p5314_p13 }
  0xaa   : > { %5324 = shalt.err (!%p5321_p5)
}
  0xab   : > { %5082 = dma.hbm_to_vmem [thread:$0]  (!%p6489_p10), %s5730_s25, 2048, %s5732_s21, %s5628_s4, %s6481_s16, %s6481_s16, %s6480_s30  }
  0xac   : > { %p6490_p9 = scmp.ne.s32.totalorder %s6471_s22, 0 }
  0xae   : > { %427 = sbr.rel (%p6490_p9) target bundleno = 1234 (0x4d2), region = 56 }
  0xb5   : > { %s5762_s24 = sand.u32 1, %s5399_s10   ;;  %p6491_p3 = scmp.ne.s32.totalorder %s6466_s19, 0 }
  0xb6   : > { %s4188_s7 = sshll.u32 %s5762_s24, 6  ;;  %s430_s9 = scalar_lea.sflag [#allocation3], %s5762_s24 }
  0xb7   : > { %s5766_s18 = scalar_lea.vmem [#allocation2], %s4188_s7 }
  0xb8   : > { %5378 = dma.done.wait (%p6491_p3), %s430_s9, 1024  }
  0xb9   : > { %5380 = vsyncadd (%p6491_p3), %s430_s9, 4294966272  ;;  %s438_s20 = sand.u32 1, %s5508_s15   ;;  %s5773_s4 = scalar_lea.vmem [#allocation5], %s4188_s7 }
  0xba   : > { %s439_s22 = scalar_lea.sflag [#allocation6], %s438_s20 }
  0xbb   : > { %5382 = dma.done.wait (%p6491_p3), %s439_s22, 3072  }
  0xbc   : > { %5384 = vsyncadd (%p6491_p3), %s439_s22, 4294964224  ;;  %s4190_s30 = sshll.u32 %s5762_s24, 7  ;;  %p6492_p10 = scmp.eq.s32.totalorder %s5508_s15, 0 }
  0xbd   : > { %s5782_s16 = scalar_lea.vmem [#allocation7], %s4190_s30 }
  0xbe   : > { %5386 = dma.done.wait (%p6492_p10), [#allocation9], 512   ;;  %p6493_p12 = pmov %p6492_p10 }
  0xbf   : > { %p517_p1 = scmp.lt.s32.totalorder %s5407_s12, 1  ;;  %v609_v0 = vld [vmem:[#allocation8] sm:$0xff]  ;;  %v610_v1 = vld [vmem:[#allocation8 + $0x8] sm:$0xff]  ;;  %vm611_vm0 = vcmask 130048   ;;  %v5832_v30 = vld [vmem:[%s5766_s18 + $0x10] sm:$0xff]  ;;  %s6494_s1 = sld [smem:[#allocation33_spill]] }
  0xc0   : > { %5388 = vsyncadd (%p6493_p12), [#allocation9], 4294966784  ;;  %v4914_v3 = vpack.c.bf16 %v610_v1, %v609_v0  ;;  %v5818_v26 = vld [vmem:[%s5766_s18] sm:$0xff]  ;;  %v5829_v29 = vld [vmem:[%s5766_s18 + $0x8] sm:$0xff]  ;;  %s6501_s7 = sld [smem:[#allocation29_spill]]  ;;  %vm3962_vm1 = vcmask 261120  }
  0xc1   : > { %s518_s21 = scalar_select %p517_p1, %s5407_s12, 1  ;;  %v5842_v33 = vld [vmem:[%s5766_s18 + $0x18] sm:$0xff]  ;;  %v5845_v34 = vld [vmem:[%s5766_s18 + $0x20] sm:$0xff]  ;;  %v5854_v37 = vld [vmem:[%s5766_s18 + $0x28] sm:$0xff] }
  0xc2   : > { %4915 = vmatprep.subr.bf16.mxu0 %v4914_v3  ;;  %v5857_v38 = vld [vmem:[%s5766_s18 + $0x30] sm:$0xff]  ;;  %v5866_v41 = vld [vmem:[%s5766_s18 + $0x38] sm:$0xff]  ;;  %v561_v42 = vld [vmem:[%s5773_s4] sm:$0xff]  ;;  %s6311_s17 = scalar_lea.vmem [#allocation11], %s4190_s30  ;;  %s4349_s30 = sshll.u32 %s5407_s12, 11 }
  0xc3   : > { %s4348_s25 = sshll.u32 %s518_s21, 6  ;;  %4917 = vmatpush3.bf16.msra.mxu0 %v4914_v3  ;;  %v562_v45 = vld [vmem:[%s5773_s4 + $0x8] sm:$0xff]  ;;  %v563_v46 = vld [vmem:[%s5773_s4 + $0x10] sm:$0xff]  ;;  %v564_v49 = vld [vmem:[%s5773_s4 + $0x18] sm:$0xff]  ;;  %s3996_s6 = sshll.u32 %s6311_s17, 4  ;;  %s6360_s6 = int_to_ptr.vmem [resolvable:$true] %s3996_s6 }
  0xc4   : > { %s525_s23 = scalar_lea.vmem %s6415_s2, %s4348_s25  ;;  %v565_v50 = vld [vmem:[%s5773_s4 + $0x20] sm:$0xff]  ;;  %v566_v53 = vld [vmem:[%s5773_s4 + $0x28] sm:$0xff]  ;;  %v567_v54 = vld [vmem:[%s5773_s4 + $0x30] sm:$0xff]  ;;  %s6523_s5 = sld [smem:[#allocation17_spill]] }
  0xc5   : > { %v529_v2 = vld [vmem:[%s525_s23] sm:$0xff]  ;;  %v530_v5 = vld [vmem:[%s525_s23 + $0x8] sm:$0xff]  ;;  %v531_v6 = vld [vmem:[%s525_s23 + $0x10] sm:$0xff]  ;;  %s6524_s28 = sld [smem:[#allocation34_spill]]  ;;  %s3980_s12 = scalar_lea.sflag [#allocation4], %s5762_s24 }
  0xc6   : > { %v537_v4 = vand.u32 2147483647, %v529_v2  ;;  %v532_v7 = vld [vmem:[%s525_s23 + $0x18] sm:$0xff]  ;;  %v538_v8 = vand.u32 2147483647, %v530_v5  ;;  %v533_v12 = vld [vmem:[%s525_s23 + $0x20] sm:$0xff] }
  0xc7   : > { %v539_v9 = vand.u32 2147483647, %v531_v6  ;;  %v540_v11 = vand.u32 2147483647, %v532_v7  ;;  %v534_v15 = vld [vmem:[%s525_s23 + $0x28] sm:$0xff]  ;;  %v535_v17 = vld [vmem:[%s525_s23 + $0x30] sm:$0xff] }
  0xc8   : > { %v5793_v10 = vadd.f32 1e-12, %v537_v4  ;;  %v5795_v13 = vadd.f32 1e-12, %v538_v8  ;;  %v541_v16 = vand.u32 2147483647, %v533_v12 }
  0xc9   : > { %v5797_v14 = vadd.f32 1e-12, %v539_v9  ;;  %v5803_v18 = vadd.f32 1e-12, %v540_v11  ;;  %v542_v19 = vand.u32 2147483647, %v534_v15 }
  0xca   : > { %4566 = vmatprep.mubr.msk.f32.mxu0 %vm611_vm0, %v5793_v10  ;;  %v5807_v20 = vadd.f32 1e-12, %v541_v16  ;;  %v543_v21 = vand.u32 2147483647, %v535_v17  ;;  %v536_v22 = vld [vmem:[%s525_s23 + $0x38] sm:$0xff]  ;;  %v569_v28 = vmul.f32 %v5818_v26, %v5793_v10  ;;  %v570_v31 = vmul.f32 %v5829_v29, %v5795_v13  ;;  %s5325_s18 = scalar_lea.vmem %s6360_s6, 2048 }
  0xcb   : > { %4567 = vmatmul.mubr.msk.f32.vlgmr.msra.gmra.mrb[0].mxu0 %vm611_vm0, %v5795_v13  ;;  %v5811_v23 = vadd.f32 1e-12, %v542_v19  ;;  %v544_v24 = vand.u32 2147483647, %v536_v22  ;;  %v571_v32 = vmul.f32 %v5832_v30, %v5797_v14  ;;  %v572_v35 = vmul.f32 %v5842_v33, %v5803_v18  ;;  %v568_v57 = vld [vmem:[%s5773_s4 + $0x38] sm:$0xff]  ;;  %v5936_v19 = vld [vmem:[#allocation10] sm:$0xff]  ;;  %s6358_s9 = scalar_lea.hbm %s6524_s28, %s4349_s30  ;;  %p5326_p4 = scmp.ne.s32.totalorder %s6360_s6, %s5325_s18 }
  0xcc   : > { %4569 = vmatprep.mubr.msk.f32.mxu0 %vm611_vm0, %v5797_v14  ;;  %v5815_v25 = vadd.f32 1e-12, %v543_v21  ;;  %v573_v36 = vmul.f32 %v5845_v34, %v5807_v20  ;;  %v577_v44 = vmul.f32 %v561_v42, %v5793_v10  ;;  %v578_v47 = vmul.f32 %v562_v45, %v5795_v13  ;;  %4642 = vmatprep.mubr.msk.f32.mxu1 %vm611_vm0, %v5936_v19  ;;  %s6522_s4 = sld [smem:[#allocation32_spill]]  ;;  %p6525_p0 = scmp.ne.s32.totalorder %s6523_s5, 0 }
  0xcd   : > { %v5822_v27 = vadd.f32 1e-12, %v544_v24  ;;  %v574_v39 = vmul.f32 %v5854_v37, %v5811_v23  ;;  %v579_v48 = vmul.f32 %v563_v46, %v5797_v14  ;;  %v580_v51 = vmul.f32 %v564_v49, %v5803_v18  ;;  %s5424_s20 = smov [#allocation11]  }
  0xce   : > { %v575_v40 = vmul.f32 %v5857_v38, %v5815_v25  ;;  %v581_v52 = vmul.f32 %v565_v50, %v5807_v20  ;;  %v582_v55 = vmul.f32 %v566_v53, %v5811_v23  ;;  %v583_v56 = vmul.f32 %v567_v54, %v5815_v25  ;;  %p5327_p7 = pnand %p5326_p4, %p6525_p0  ;;  %s5329_s22 = sshll.u32 %s5424_s20, 4  ;;  %s5330_s22 = int_to_ptr.vmem [resolvable:$false] %s5329_s22 }
  0xcf   : > { %4570 = vmatmul.mubr.msk.f32.gmra.mrb[2].mxu0 %vm611_vm0, %v5803_v18  ;;  %v576_v43 = vmul.f32 %v5866_v41, %v5822_v27  ;;  %v584_v58 = vmul.f32 %v568_v57, %v5822_v27  ;;  %v585_v59 = vmul.f32 %v569_v28, %v5793_v10  ;;  %v586_v60 = vmul.f32 %v570_v31, %v5795_v13  ;;  %s5331_s21 = scalar_lea.vmem %s5330_s22, 4096  ;;  %p5332_p13 = scmp.lt.s32.totalorder %s6360_s6, %s5330_s22 }
  0xd0   : > { %4572 = vmatprep.mubr.msk.f32.mxu0 %vm611_vm0, %v5807_v20  ;;  %v587_v61 = vmul.f32 %v571_v32, %v5797_v14  ;;  %v588_v62 = vmul.f32 %v572_v35, %v5803_v18  ;;  %v589_v63 = vmul.f32 %v573_v36, %v5807_v20  ;;  %v590_v0 = vmul.f32 %v574_v39, %v5811_v23  ;;  %p5328_p2 = pneg %p5327_p7  ;;  %p5333_p6 = scmp.lt.s32.totalorder %s5331_s21, %s5325_s18 }
  0xd1   : > { %v591_v1 = vmul.f32 %v575_v40, %v5815_v25  ;;  %v592_v2 = vmul.f32 %v576_v43, %v5822_v27  ;;  %v593_v3 = vmul.f32 %v585_v59, %v561_v42  ;;  %v594_v4 = vmul.f32 %v586_v60, %v562_v45 }
  0xd2   : > { %v595_v5 = vmul.f32 %v587_v61, %v563_v46  ;;  %v596_v6 = vmul.f32 %v588_v62, %v564_v49  ;;  %v597_v7 = vmul.f32 %v589_v63, %v565_v50  ;;  %v598_v8 = vmul.f32 %v590_v0, %v566_v53  ;;  %p5334_p11 = por %p5333_p6, %p5332_p13 }
  0xd3   : > { %4573 = vmatmul.mubr.msk.f32.gmra.mrb[4].mxu0 %vm611_vm0, %v5811_v23  ;;  %v599_v9 = vmul.f32 %v591_v1, %v567_v54  ;;  %v600_v10 = vmul.f32 %v592_v2, %v568_v57  ;;  %v601_v11 = vmul.f32 %v585_v59, %v5818_v26  ;;  %v602_v12 = vmul.f32 %v586_v60, %v5829_v29 }
  0xd4   : > { %4575 = vmatprep.mubr.msk.f32.mxu0 %vm611_vm0, %v5815_v25  ;;  %v603_v13 = vmul.f32 %v587_v61, %v5832_v30  ;;  %v604_v14 = vmul.f32 %v588_v62, %v5842_v33  ;;  %v605_v15 = vmul.f32 %v589_v63, %v5845_v34  ;;  %v606_v16 = vmul.f32 %v590_v0, %v5854_v37  ;;  %v5941_v25 = vld [vmem:[#allocation10 + $0x8] sm:$0xff]  ;;  %p5335_p8 = pnand %p5334_p11, %p5328_p2 }
  0xd5   : > { %v607_v17 = vmul.f32 %v591_v1, %v5857_v38  ;;  %v608_v18 = vmul.f32 %v592_v2, %v5866_v41 }
  0xd7   : > { %4576 = vmatmul.mubr.msk.f32.gmra.mrb[6].mxu0 %vm611_vm0, %v5822_v27 }
  0xd8   : > { %4578 = vmatprep.mubr.msk.f32.mxu0 %vm611_vm0, %v569_v28 }
  0xdb   : > { %4579 = vmatmul.mubr.msk.f32.gmra.mrb[8].mxu0 %vm611_vm0, %v570_v31 }
  0xdc   : > { %4581 = vmatprep.mubr.msk.f32.mxu0 %vm611_vm0, %v571_v32 }
  0xdf   : > { %4582 = vmatmul.mubr.msk.f32.gmra.mrb[10].mxu0 %vm611_vm0, %v572_v35 }
  0xe0   : > { %4584 = vmatprep.mubr.msk.f32.mxu0 %vm611_vm0, %v573_v36 }
  0xe3   : > { %4585 = vmatmul.mubr.msk.f32.gmra.mrb[12].mxu0 %vm611_vm0, %v574_v39 }
  0xe4   : > { %4587 = vmatprep.mubr.msk.f32.mxu0 %vm611_vm0, %v575_v40 }
  0xe7   : > { %4588 = vmatmul.mubr.msk.f32.gmra.mrb[14].mxu0 %vm611_vm0, %v576_v43 }
  0xe8   : > { %4590 = vmatprep.mubr.msk.f32.mxu0 %vm611_vm0, %v577_v44 }
  0xeb   : > { %4591 = vmatmul.mubr.msk.f32.gmra.mrb[16].mxu0 %vm611_vm0, %v578_v47 }
  0xec   : > { %4593 = vmatprep.mubr.msk.f32.mxu0 %vm611_vm0, %v579_v48 }
  0xef   : > { %4594 = vmatmul.mubr.msk.f32.gmra.mrb[18].mxu0 %vm611_vm0, %v580_v51 }
  0xf0   : > { %4596 = vmatprep.mubr.msk.f32.mxu0 %vm611_vm0, %v581_v52 }
  0xf3   : > { %4597 = vmatmul.mubr.msk.f32.gmra.mrb[20].mxu0 %vm611_vm0, %v582_v55 }
  0xf4   : > { %4599 = vmatprep.mubr.msk.f32.mxu0 %vm611_vm0, %v583_v56 }
  0xf7   : > { %4600 = vmatmul.mubr.msk.f32.gmra.mrb[22].mxu0 %vm611_vm0, %v584_v58 }
  0xf8   : > { %4602 = vmatprep.mubr.msk.f32.mxu0 %vm611_vm0, %v585_v59 }
  0xfb   : > { %4603 = vmatmul.mubr.msk.f32.gmra.mrb[24].mxu0 %vm611_vm0, %v586_v60 }
  0xfc   : > { %4605 = vmatprep.mubr.msk.f32.mxu0 %vm611_vm0, %v587_v61 }
  0xff   : > { %4606 = vmatmul.mubr.msk.f32.gmra.mrb[26].mxu0 %vm611_vm0, %v588_v62 }
 0x100   : > { %4608 = vmatprep.mubr.msk.f32.mxu0 %vm611_vm0, %v589_v63 }
 0x103   : > { %4609 = vmatmul.mubr.msk.f32.gmra.mrb[28].mxu0 %vm611_vm0, %v590_v0 }
 0x104   : > { %4611 = vmatprep.mubr.msk.f32.mxu0 %vm611_vm0, %v591_v1 }
 0x107   : > { %4612 = vmatmul.mubr.msk.f32.gmra.mrb[30].mxu0 %vm611_vm0, %v592_v2 }
 0x108   : > { %4614 = vmatprep.mubr.msk.f32.mxu0 %vm611_vm0, %v593_v3 }
 0x10b   : > { %4615 = vmatmul.mubr.msk.f32.gmra.mrb[32].mxu0 %vm611_vm0, %v594_v4 }
 0x10c   : > { %4617 = vmatprep.mubr.msk.f32.mxu0 %vm611_vm0, %v595_v5 }
 0x10f   : > { %4618 = vmatmul.mubr.msk.f32.gmra.mrb[34].mxu0 %vm611_vm0, %v596_v6 }
 0x110   : > { %4620 = vmatprep.mubr.msk.f32.mxu0 %vm611_vm0, %v597_v7 }
 0x113   : > { %4621 = vmatmul.mubr.msk.f32.gmra.mrb[36].mxu0 %vm611_vm0, %v598_v8 }
 0x114   : > { %4623 = vmatprep.mubr.msk.f32.mxu0 %vm611_vm0, %v599_v9 }
 0x117   : > { %4624 = vmatmul.mubr.msk.f32.gmra.mrb[38].mxu0 %vm611_vm0, %v600_v10 }
 0x118   : > { %4626 = vmatprep.mubr.msk.f32.mxu0 %vm611_vm0, %v601_v11 }
 0x11b   : > { %4627 = vmatmul.mubr.msk.f32.gmra.mrb[40].mxu0 %vm611_vm0, %v602_v12 }
 0x11c   : > { %4629 = vmatprep.mubr.msk.f32.mxu0 %vm611_vm0, %v603_v13 }
 0x11f   : > { %4630 = vmatmul.mubr.msk.f32.gmra.mrb[42].mxu0 %vm611_vm0, %v604_v14 }
 0x120   : > { %4632 = vmatprep.mubr.msk.f32.mxu0 %vm611_vm0, %v605_v15 }
 0x123   : > { %4633 = vmatmul.mubr.msk.f32.gmra.mrb[44].mxu0 %vm611_vm0, %v606_v16 }
 0x124   : > { %4635 = vmatprep.mubr.msk.f32.mxu0 %vm611_vm0, %v607_v17 }
 0x127   : > { %4636 = vmatmul.mubr.msk.f32.gmra.mrb[46].mxu0 %vm611_vm0, %v608_v18 }
 0x19e   : > { %v4568_v20 = vpop.f32.mrb[0].mxu0 }
 0x19f   : > { %v822_v21 = vpop.f32.mrb[1].mxu0 }
 0x1a0   : > { %v4918_v22 = vpack.c.bf16 %v4568_v20, %v822_v21 }
 0x1a2   : > { %v4571_v23 = vpop.f32.mrb[2].mxu0  ;;  %4919 = vmatprep.subr.bf16.mxu1 %v4918_v22 }
 0x1a3   : > { %v832_v24 = vpop.f32.mrb[3].mxu0  ;;  %4921 = vmatpush3.bf16.msra.mxu1 %v4918_v22 }
 0x1a4   : > { %v4922_v26 = vpack.c.bf16 %v4571_v23, %v832_v24 }
 0x1a6   : > { %v4574_v27 = vpop.f32.mrb[4].mxu0  ;;  %4643 = vmatmul.mubr.msk.f32.vlgmr.msra.gmra.mrb[0].mxu1 %vm611_vm0, %v5941_v25  ;;  %4923 = vmatprep.subr.bf16.mxu1 %v4922_v26 }
 0x1a7   : > { %v842_v28 = vpop.f32.mrb[5].mxu0  ;;  %4925 = vmatpush3.bf16.msra.mxu1 %v4922_v26  ;;  %4649 = vmatprep.mubr.msk.f32.mxu1 %vm611_vm0, %v5936_v19 }
 0x1a8   : > { %v4926_v29 = vpack.c.bf16 %v4574_v27, %v842_v28 }
 0x1aa   : > { %v4577_v30 = vpop.f32.mrb[6].mxu0  ;;  %4650 = vmatmul.mubr.msk.f32.vlgmr.msra.gmra.mrb[2].mxu1 %vm611_vm0, %v5941_v25  ;;  %4927 = vmatprep.subr.bf16.mxu1 %v4926_v29 }
 0x1ab   : > { %v852_v31 = vpop.f32.mrb[7].mxu0  ;;  %4929 = vmatpush3.bf16.msra.mxu1 %v4926_v29  ;;  %4656 = vmatprep.mubr.msk.f32.mxu1 %vm611_vm0, %v5936_v19 }
 0x1ac   : > { %v4930_v32 = vpack.c.bf16 %v4577_v30, %v852_v31  ;;  %v3023_v31 = vld [vmem:[%s6494_s1] sm:$0xff] }
 0x1ae   : > { %v4580_v33 = vpop.f32.mrb[8].mxu0  ;;  %4657 = vmatmul.mubr.msk.f32.vlgmr.msra.gmra.mrb[4].mxu1 %vm611_vm0, %v5941_v25  ;;  %4931 = vmatprep.subr.bf16.mxu1 %v4930_v32 }
 0x1af   : > { %v862_v34 = vpop.f32.mrb[9].mxu0  ;;  %4933 = vmatpush3.bf16.msra.mxu1 %v4930_v32  ;;  %4663 = vmatprep.mubr.msk.f32.mxu1 %vm611_vm0, %v5936_v19  ;;  %v3024_v32 = vld [vmem:[%s6494_s1 + $0x8] sm:$0xff] }
 0x1b0   : > { %v4934_v35 = vpack.c.bf16 %v4580_v33, %v862_v34  ;;  %v5014_v33 = vpack.c.bf16 %v3024_v32, %v3023_v31 }
 0x1b2   : > { %v4583_v36 = vpop.f32.mrb[10].mxu0  ;;  %4664 = vmatmul.mubr.msk.f32.vlgmr.msra.gmra.mrb[6].mxu1 %vm611_vm0, %v5941_v25  ;;  %4935 = vmatprep.subr.bf16.mxu1 %v4934_v35 }
 0x1b3   : > { %v872_v37 = vpop.f32.mrb[11].mxu0  ;;  %4937 = vmatpush3.bf16.msra.mxu1 %v4934_v35  ;;  %4670 = vmatprep.mubr.msk.f32.mxu1 %vm611_vm0, %v5936_v19 }
 0x1b4   : > { %v4938_v38 = vpack.c.bf16 %v4583_v36, %v872_v37  ;;  %5015 = vmatprep.subr.bf16.mxu0 %v5014_v33 }
 0x1b5   : > { %5017 = vmatpush3.bf16.msra.mxu0 %v5014_v33 }
 0x1b6   : > { %v4586_v39 = vpop.f32.mrb[12].mxu0  ;;  %4671 = vmatmul.mubr.msk.f32.vlgmr.msra.gmra.mrb[8].mxu1 %vm611_vm0, %v5941_v25  ;;  %4939 = vmatprep.subr.bf16.mxu1 %v4938_v38 }
 0x1b7   : > { %v882_v40 = vpop.f32.mrb[13].mxu0  ;;  %4941 = vmatpush3.bf16.msra.mxu1 %v4938_v38  ;;  %4677 = vmatprep.mubr.msk.f32.mxu1 %vm611_vm0, %v5936_v19 }
 0x1b8   : > { %v4942_v41 = vpack.c.bf16 %v4586_v39, %v882_v40 }
 0x1ba   : > { %v4589_v42 = vpop.f32.mrb[14].mxu0  ;;  %4678 = vmatmul.mubr.msk.f32.vlgmr.msra.gmra.mrb[10].mxu1 %vm611_vm0, %v5941_v25  ;;  %4943 = vmatprep.subr.bf16.mxu1 %v4942_v41 }
 0x1bb   : > { %v892_v43 = vpop.f32.mrb[15].mxu0  ;;  %4945 = vmatpush3.bf16.msra.mxu1 %v4942_v41  ;;  %4684 = vmatprep.mubr.msk.f32.mxu1 %vm611_vm0, %v5936_v19 }
 0x1bc   : > { %v4946_v44 = vpack.c.bf16 %v4589_v42, %v892_v43 }
 0x1be   : > { %v4592_v45 = vpop.f32.mrb[16].mxu0  ;;  %4685 = vmatmul.mubr.msk.f32.vlgmr.msra.gmra.mrb[12].mxu1 %vm611_vm0, %v5941_v25  ;;  %4947 = vmatprep.subr.bf16.mxu1 %v4946_v44 }
 0x1bf   : > { %v902_v46 = vpop.f32.mrb[17].mxu0  ;;  %4949 = vmatpush3.bf16.msra.mxu1 %v4946_v44  ;;  %4691 = vmatprep.mubr.msk.f32.mxu1 %vm611_vm0, %v5936_v19 }
 0x1c0   : > { %v4950_v47 = vpack.c.bf16 %v4592_v45, %v902_v46 }
 0x1c2   : > { %v4595_v48 = vpop.f32.mrb[18].mxu0  ;;  %4692 = vmatmul.mubr.msk.f32.vlgmr.msra.gmra.mrb[14].mxu1 %vm611_vm0, %v5941_v25  ;;  %4951 = vmatprep.subr.bf16.mxu1 %v4950_v47 }
 0x1c3   : > { %v912_v49 = vpop.f32.mrb[19].mxu0  ;;  %4953 = vmatpush3.bf16.msra.mxu1 %v4950_v47  ;;  %4698 = vmatprep.mubr.msk.f32.mxu1 %vm611_vm0, %v5936_v19 }
 0x1c4   : > { %v4954_v50 = vpack.c.bf16 %v4595_v48, %v912_v49 }
 0x1c6   : > { %v4598_v51 = vpop.f32.mrb[20].mxu0  ;;  %4699 = vmatmul.mubr.msk.f32.vlgmr.msra.gmra.mrb[16].mxu1 %vm611_vm0, %v5941_v25  ;;  %4955 = vmatprep.subr.bf16.mxu1 %v4954_v50 }
 0x1c7   : > { %v922_v52 = vpop.f32.mrb[21].mxu0  ;;  %4957 = vmatpush3.bf16.msra.mxu1 %v4954_v50  ;;  %4705 = vmatprep.mubr.msk.f32.mxu1 %vm611_vm0, %v5936_v19 }
 0x1c8   : > { %v4958_v53 = vpack.c.bf16 %v4598_v51, %v922_v52 }
 0x1ca   : > { %v4601_v54 = vpop.f32.mrb[22].mxu0  ;;  %4706 = vmatmul.mubr.msk.f32.vlgmr.msra.gmra.mrb[18].mxu1 %vm611_vm0, %v5941_v25  ;;  %4959 = vmatprep.subr.bf16.mxu1 %v4958_v53 }
 0x1cb   : > { %v932_v55 = vpop.f32.mrb[23].mxu0  ;;  %4961 = vmatpush3.bf16.msra.mxu1 %v4958_v53  ;;  %4712 = vmatprep.mubr.msk.f32.mxu1 %vm611_vm0, %v5936_v19 }
 0x1cc   : > { %v4962_v56 = vpack.c.bf16 %v4601_v54, %v932_v55 }
 0x1ce   : > { %v4604_v57 = vpop.f32.mrb[24].mxu0  ;;  %4713 = vmatmul.mubr.msk.f32.vlgmr.msra.gmra.mrb[20].mxu1 %vm611_vm0, %v5941_v25  ;;  %4963 = vmatprep.subr.bf16.mxu1 %v4962_v56 }
 0x1cf   : > { %v942_v58 = vpop.f32.mrb[25].mxu0  ;;  %4965 = vmatpush3.bf16.msra.mxu1 %v4962_v56  ;;  %4719 = vmatprep.mubr.msk.f32.mxu1 %vm611_vm0, %v5936_v19  ;;  %v2870_v56 = vld [vmem:[%s6501_s7 + $0x8] sm:$0xff] }
 0x1d0   : > { %v4966_v59 = vpack.c.bf16 %v4604_v57, %v942_v58  ;;  %v2869_v57 = vld [vmem:[%s6501_s7] sm:$0xff] }
 0x1d2   : > { %v4607_v60 = vpop.f32.mrb[26].mxu0  ;;  %4720 = vmatmul.mubr.msk.f32.vlgmr.msra.gmra.mrb[22].mxu1 %vm611_vm0, %v5941_v25  ;;  %4967 = vmatprep.subr.bf16.mxu1 %v4966_v59 }
 0x1d3   : > { %v952_v61 = vpop.f32.mrb[27].mxu0  ;;  %4969 = vmatpush3.bf16.msra.mxu1 %v4966_v59  ;;  %4726 = vmatprep.mubr.msk.f32.mxu1 %vm611_vm0, %v5936_v19 }
 0x1d4   : > { %v4970_v62 = vpack.c.bf16 %v4607_v60, %v952_v61 }
 0x1d6   : > { %v4610_v63 = vpop.f32.mrb[28].mxu0  ;;  %4727 = vmatmul.mubr.msk.f32.vlgmr.msra.gmra.mrb[24].mxu1 %vm611_vm0, %v5941_v25  ;;  %4971 = vmatprep.subr.bf16.mxu1 %v4970_v62 }
 0x1d7   : > { %v962_v0 = vpop.f32.mrb[29].mxu0  ;;  %4973 = vmatpush3.bf16.msra.mxu1 %v4970_v62  ;;  %4733 = vmatprep.mubr.msk.f32.mxu1 %vm611_vm0, %v5936_v19 }
 0x1d8   : > { %v4974_v1 = vpack.c.bf16 %v4610_v63, %v962_v0 }
 0x1da   : > { %v4613_v2 = vpop.f32.mrb[30].mxu0  ;;  %4734 = vmatmul.mubr.msk.f32.vlgmr.msra.gmra.mrb[26].mxu1 %vm611_vm0, %v5941_v25  ;;  %4975 = vmatprep.subr.bf16.mxu1 %v4974_v1 }
 0x1db   : > { %v972_v3 = vpop.f32.mrb[31].mxu0  ;;  %4977 = vmatpush3.bf16.msra.mxu1 %v4974_v1  ;;  %4740 = vmatprep.mubr.msk.f32.mxu1 %vm611_vm0, %v5936_v19 }
 0x1dc   : > { %v4978_v4 = vpack.c.bf16 %v4613_v2, %v972_v3 }
 0x1de   : > { %v4616_v5 = vpop.f32.mrb[32].mxu0  ;;  %4741 = vmatmul.mubr.msk.f32.vlgmr.msra.gmra.mrb[28].mxu1 %vm611_vm0, %v5941_v25  ;;  %4979 = vmatprep.subr.bf16.mxu1 %v4978_v4 }
 0x1df   : > { %v982_v6 = vpop.f32.mrb[33].mxu0  ;;  %4981 = vmatpush3.bf16.msra.mxu1 %v4978_v4  ;;  %4747 = vmatprep.mubr.msk.f32.mxu1 %vm611_vm0, %v5936_v19 }
 0x1e0   : > { %v4982_v7 = vpack.c.bf16 %v4616_v5, %v982_v6 }
 0x1e2   : > { %v4619_v8 = vpop.f32.mrb[34].mxu0  ;;  %4748 = vmatmul.mubr.msk.f32.vlgmr.msra.gmra.mrb[30].mxu1 %vm611_vm0, %v5941_v25  ;;  %4983 = vmatprep.subr.bf16.mxu1 %v4982_v7 }
 0x1e3   : > { %v992_v9 = vpop.f32.mrb[35].mxu0  ;;  %4985 = vmatpush3.bf16.msra.mxu1 %v4982_v7  ;;  %4754 = vmatprep.mubr.msk.f32.mxu1 %vm611_vm0, %v5936_v19 }
 0x1e4   : > { %v4986_v10 = vpack.c.bf16 %v4619_v8, %v992_v9 }
 0x1e6   : > { %v4622_v11 = vpop.f32.mrb[36].mxu0  ;;  %4755 = vmatmul.mubr.msk.f32.vlgmr.msra.gmra.mrb[32].mxu1 %vm611_vm0, %v5941_v25  ;;  %4987 = vmatprep.subr.bf16.mxu1 %v4986_v10 }
 0x1e7   : > { %v1002_v12 = vpop.f32.mrb[37].mxu0  ;;  %4989 = vmatpush3.bf16.msra.mxu1 %v4986_v10  ;;  %4761 = vmatprep.mubr.msk.f32.mxu1 %vm611_vm0, %v5936_v19 }
 0x1e8   : > { %v4990_v13 = vpack.c.bf16 %v4622_v11, %v1002_v12 }
 0x1ea   : > { %v4625_v14 = vpop.f32.mrb[38].mxu0  ;;  %4762 = vmatmul.mubr.msk.f32.vlgmr.msra.gmra.mrb[34].mxu1 %vm611_vm0, %v5941_v25  ;;  %4991 = vmatprep.subr.bf16.mxu1 %v4990_v13 }
 0x1eb   : > { %v1012_v15 = vpop.f32.mrb[39].mxu0  ;;  %4993 = vmatpush3.bf16.msra.mxu1 %v4990_v13  ;;  %4768 = vmatprep.mubr.msk.f32.mxu1 %vm611_vm0, %v5936_v19 }
 0x1ec   : > { %v4994_v16 = vpack.c.bf16 %v4625_v14, %v1012_v15 }
 0x1ee   : > { %v4628_v17 = vpop.f32.mrb[40].mxu0  ;;  %4769 = vmatmul.mubr.msk.f32.vlgmr.msra.gmra.mrb[36].mxu1 %vm611_vm0, %v5941_v25  ;;  %4995 = vmatprep.subr.bf16.mxu1 %v4994_v16 }
 0x1ef   : > { %v1022_v18 = vpop.f32.mrb[41].mxu0  ;;  %4997 = vmatpush3.bf16.msra.mxu1 %v4994_v16  ;;  %4775 = vmatprep.mubr.msk.f32.mxu1 %vm611_vm0, %v5936_v19 }
 0x1f0   : > { %v4998_v20 = vpack.c.bf16 %v4628_v17, %v1022_v18 }
 0x1f2   : > { %v4631_v21 = vpop.f32.mrb[42].mxu0  ;;  %4776 = vmatmul.mubr.msk.f32.vlgmr.msra.gmra.mrb[38].mxu1 %vm611_vm0, %v5941_v25  ;;  %4999 = vmatprep.subr.bf16.mxu1 %v4998_v20 }
 0x1f3   : > { %v1032_v22 = vpop.f32.mrb[43].mxu0  ;;  %5001 = vmatpush3.bf16.msra.mxu1 %v4998_v20  ;;  %4782 = vmatprep.mubr.msk.f32.mxu1 %vm611_vm0, %v5936_v19 }
 0x1f4   : > { %v5002_v23 = vpack.c.bf16 %v4631_v21, %v1032_v22 }
 0x1f6   : > { %v4634_v24 = vpop.f32.mrb[44].mxu0  ;;  %4783 = vmatmul.mubr.msk.f32.vlgmr.msra.gmra.mrb[40].mxu1 %vm611_vm0, %v5941_v25  ;;  %5003 = vmatprep.subr.bf16.mxu1 %v5002_v23 }
 0x1f7   : > { %v1042_v26 = vpop.f32.mrb[45].mxu0  ;;  %5005 = vmatpush3.bf16.msra.mxu1 %v5002_v23  ;;  %4789 = vmatprep.mubr.msk.f32.mxu1 %vm611_vm0, %v5936_v19 }
 0x1f8   : > { %v5006_v27 = vpack.c.bf16 %v4634_v24, %v1042_v26 }
 0x1fa   : > { %v4637_v28 = vpop.f32.mrb[46].mxu0  ;;  %4790 = vmatmul.mubr.msk.f32.vlgmr.msra.gmra.mrb[42].mxu1 %vm611_vm0, %v5941_v25  ;;  %5007 = vmatprep.subr.bf16.mxu1 %v5006_v27 }
 0x1fb   : > { %v1052_v29 = vpop.f32.mrb[47].mxu0  ;;  %5009 = vmatpush3.bf16.msra.mxu1 %v5006_v27  ;;  %4796 = vmatprep.mubr.msk.f32.mxu1 %vm611_vm0, %v5936_v19 }
 0x1fc   : > { %v5010_v30 = vpack.c.bf16 %v4637_v28, %v1052_v29 }
 0x1fe   : > { %4797 = vmatmul.mubr.msk.f32.vlgmr.msra.gmra.mrb[44].mxu1 %vm611_vm0, %v5941_v25  ;;  %5011 = vmatprep.subr.bf16.mxu1 %v5010_v30 }
 0x1ff   : > { %5013 = vmatpush3.bf16.msra.mxu1 %v5010_v30  ;;  %4803 = vmatprep.mubr.msk.f32.mxu1 %vm611_vm0, %v5936_v19 }
 0x202   : > { %4804 = vmatmul.mubr.msk.f32.vlgmr.msra.gmra.mrb[46].mxu1 %vm611_vm0, %v5941_v25 }
 0x279   : > { %v6043_v34 = vpop.f32.mrb[0].mxu1 }
 0x27a   : > { %v6045_v35 = vpop.f32.mrb[1].mxu1  ;;  %5147 = vrcp.f32 %v6043_v34 }
 0x27b   : > { %5149 = vrcp.f32 %v6045_v35 }
 0x27d   : > { %v6047_v36 = vpop.f32.mrb[2].mxu1 }
 0x27e   : > { %v6049_v19 = vpop.f32.mrb[3].mxu1  ;;  %5151 = vrcp.f32 %v6047_v36 }
 0x27f   : > { %5153 = vrcp.f32 %v6049_v19 }
 0x281   : > { %v6051_v25 = vpop.f32.mrb[4].mxu1 }
 0x282   : > { %v6053_v37 = vpop.f32.mrb[5].mxu1 }
 0x285   : > { %v6055_v38 = vpop.f32.mrb[6].mxu1 }
 0x286   : > { %v6057_v39 = vpop.f32.mrb[7].mxu1 }
 0x289   : > { %v6059_v40 = vpop.f32.mrb[8].mxu1 }
 0x28a   : > { %v6061_v41 = vpop.f32.mrb[9].mxu1 }
 0x28d   : > { %v6063_v42 = vpop.f32.mrb[10].mxu1 }
 0x28e   : > { %v6065_v43 = vpop.f32.mrb[11].mxu1 }
 0x291   : > { %v6067_v44 = vpop.f32.mrb[12].mxu1 }
 0x292   : > { %v6069_v45 = vpop.f32.mrb[13].mxu1 }
 0x295   : > { %v6071_v46 = vpop.f32.mrb[14].mxu1 }
 0x296   : > { %6495 = vst [vmem:[#allocation19_spill] sm:$0xff] %v6071_v46  ;;  %v6073_v47 = vpop.f32.mrb[15].mxu1 }
 0x297   : > { %6496 = vst [vmem:[#allocation20_spill] sm:$0xff] %v6073_v47 }
 0x299   : > { %v6075_v48 = vpop.f32.mrb[16].mxu1 }
 0x29a   : > { %v6077_v49 = vpop.f32.mrb[17].mxu1 }
 0x29d   : > { %v6079_v50 = vpop.f32.mrb[18].mxu1 }
 0x29e   : > { %v6081_v51 = vpop.f32.mrb[19].mxu1 }
 0x2a1   : > { %v6083_v52 = vpop.f32.mrb[20].mxu1 }
 0x2a2   : > { %6497 = vst [vmem:[#allocation21_spill] sm:$0xff] %v6083_v52  ;;  %v6085_v53 = vpop.f32.mrb[21].mxu1 }
 0x2a3   : > { %6498 = vst [vmem:[#allocation22_spill] sm:$0xff] %v6085_v53 }
 0x2a5   : > { %v6087_v54 = vpop.f32.mrb[22].mxu1 }
 0x2a6   : > { %6499 = vst [vmem:[#allocation23_spill] sm:$0xff] %v6087_v54  ;;  %v6089_v55 = vpop.f32.mrb[23].mxu1 }
 0x2a7   : > { %6500 = vst [vmem:[#allocation24_spill] sm:$0xff] %v6089_v55 }
 0x2a9   : > { %v4728_v58 = vpop.f32.mrb[24].mxu1 }
 0x2aa   : > { %v2872_v59 = vmul.f32 %v4728_v58, %v2870_v56  ;;  %v2035_v60 = vpop.f32.mrb[25].mxu1 }
 0x2ab   : > { %v2871_v61 = vmul.f32 %v2869_v57, %v2035_v60 }
 0x2ac   : > { %v6098_v62 = vmul.f32 %v6075_v48, %v2872_v59  ;;  %v2880_v63 = vmul.f32 %v6059_v40, %v2872_v59 }
 0x2ad   : > { %v4735_v0 = vpop.f32.mrb[26].mxu1  ;;  %v6102_v1 = vmul.f32 %v2871_v61, %v6077_v49  ;;  %v2879_v2 = vmul.f32 %v2871_v61, %v6061_v41 }
 0x2ae   : > { %v2874_v3 = vmul.f32 %v4735_v0, %v2870_v56  ;;  %v2110_v4 = vpop.f32.mrb[27].mxu1 }
 0x2af   : > { %v2873_v5 = vmul.f32 %v2869_v57, %v2110_v4 }
 0x2b0   : > { %v6106_v6 = vmul.f32 %v6079_v50, %v2874_v3  ;;  %v2882_v7 = vmul.f32 %v6063_v42, %v2874_v3 }
 0x2b1   : > { %v4742_v8 = vpop.f32.mrb[28].mxu1  ;;  %v6110_v9 = vmul.f32 %v2873_v5, %v6081_v51  ;;  %v2881_v10 = vmul.f32 %v2873_v5, %v6065_v43 }
 0x2b2   : > { %v2876_v11 = vmul.f32 %v4742_v8, %v2870_v56  ;;  %v2185_v12 = vpop.f32.mrb[29].mxu1 }
 0x2b3   : > { %v2875_v13 = vmul.f32 %v2869_v57, %v2185_v12 }
 0x2b4   : > { %v6114_v14 = vmul.f32 %v6083_v52, %v2876_v11  ;;  %v2884_v15 = vmul.f32 %v6067_v44, %v2876_v11 }
 0x2b5   : > { %v4749_v16 = vpop.f32.mrb[30].mxu1  ;;  %v6118_v17 = vmul.f32 %v2875_v13, %v6085_v53  ;;  %v2883_v18 = vmul.f32 %v2875_v13, %v6069_v45 }
 0x2b6   : > { %v2878_v20 = vmul.f32 %v4749_v16, %v2870_v56  ;;  %v2260_v21 = vpop.f32.mrb[31].mxu1 }
 0x2b7   : > { %v2877_v22 = vmul.f32 %v2869_v57, %v2260_v21 }
 0x2b8   : > { %v6122_v23 = vmul.f32 %v6087_v54, %v2878_v20  ;;  %v2886_v24 = vmul.f32 %v6071_v46, %v2878_v20 }
 0x2b9   : > { %v6125_v26 = vpop.f32.mrb[32].mxu1  ;;  %v6128_v27 = vmul.f32 %v2877_v22, %v6089_v55  ;;  %v2885_v28 = vmul.f32 %v2877_v22, %v6073_v47 }
 0x2ba   : > { %6502 = vst [vmem:[#allocation25_spill] sm:$0xff] %v6122_v23  ;;  %v6133_v30 = vpop.f32.mrb[33].mxu1 }
 0x2bb   : > { %6503 = vst [vmem:[#allocation26_spill] sm:$0xff] %v6128_v27 }
 0x2bd   : > { %v6137_v32 = vpop.f32.mrb[34].mxu1 }
 0x2be   : > { %v6141_v56 = vpop.f32.mrb[35].mxu1 }
 0x2c1   : > { %v6145_v58 = vpop.f32.mrb[36].mxu1 }
 0x2c2   : > { %v6149_v60 = vpop.f32.mrb[37].mxu1 }
 0x2c5   : > { %v6153_v0 = vpop.f32.mrb[38].mxu1 }
 0x2c6   : > { %v6157_v4 = vpop.f32.mrb[39].mxu1 }
 0x2c7   : > { %6504 = vst [vmem:[#allocation27_spill] sm:$0xff] %v6157_v4 }
 0x2c9   : > { %v4784_v8 = vpop.f32.mrb[40].mxu1 }
 0x2ca   : > { %v2888_v11 = vsub.f32 %v4784_v8, %v2880_v63  ;;  %v2635_v12 = vpop.f32.mrb[41].mxu1 }
 0x2cb   : > { %v2887_v13 = vsub.f32 %v2635_v12, %v2879_v2 }
 0x2cc   : > { %v2896_v16 = vand.u32 2147483647, %v2888_v11 }
 0x2cd   : > { %v2895_v20 = vand.u32 2147483647, %v2887_v13  ;;  %v4791_v21 = vpop.f32.mrb[42].mxu1 }
 0x2ce   : > { %v2920_v22 = vadd.f32 1e-08, %v2896_v16  ;;  %v2890_v3 = vsub.f32 %v4791_v21, %v2882_v7  ;;  %v2710_v61 = vpop.f32.mrb[43].mxu1 }
 0x2cf   : > { %v2919_v59 = vadd.f32 1e-08, %v2895_v20  ;;  %v2889_v5 = vsub.f32 %v2710_v61, %v2881_v10  ;;  %v5148_v10 = vpop.eup %5147 }
 0x2d0   : > { %5155 = vrcp.f32 %v2920_v22  ;;  %v2898_v63 = vand.u32 2147483647, %v2890_v3 }
 0x2d1   : > { %5157 = vrcp.f32 %v2919_v59  ;;  %v2897_v2 = vand.u32 2147483647, %v2889_v5  ;;  %v4798_v8 = vpop.f32.mrb[44].mxu1  ;;  %v5150_v5 = vpop.eup %5149 }
 0x2d2   : > { %5159 = vrcp.f32 %v6051_v25  ;;  %v2922_v11 = vadd.f32 1e-08, %v2898_v63  ;;  %v2892_v12 = vsub.f32 %v4798_v8, %v2884_v15  ;;  %v2785_v13 = vpop.f32.mrb[45].mxu1  ;;  %v5152_v55 = vpop.eup %5151  ;;  %v2992_v8 = vmul.f32 %v5148_v10, %v6043_v34 }
 0x2d3   : > { %5161 = vrcp.f32 %v6053_v37  ;;  %v2921_v57 = vadd.f32 1e-08, %v2897_v2  ;;  %v2891_v16 = vsub.f32 %v2785_v13, %v2883_v18  ;;  %v5154_v63 = vpop.eup %5153 }
 0x2d4   : > { %5163 = vrcp.f32 %v2922_v11  ;;  %v2900_v7 = vand.u32 2147483647, %v2892_v12  ;;  %v2991_v12 = vmul.f32 %v5150_v5, %v6045_v35 }
 0x2d5   : > { %5165 = vrcp.f32 %v2921_v57  ;;  %v2899_v21 = vand.u32 2147483647, %v2891_v16  ;;  %v4805_v20 = vpop.f32.mrb[46].mxu1 }
 0x2d6   : > { %v2924_v61 = vadd.f32 1e-08, %v2900_v7  ;;  %v2894_v3 = vsub.f32 %v4805_v20, %v2886_v24  ;;  %v2860_v33 = vpop.f32.mrb[47].mxu1  ;;  %v2994_v24 = vmul.f32 %v5152_v55, %v6047_v36  ;;  %v3000_v20 = vsub.f32 2.0, %v2992_v8 }
 0x2d7   : > { %v2923_v31 = vadd.f32 1e-08, %v2899_v21  ;;  %v2893_v29 = vsub.f32 %v2860_v33, %v2885_v28  ;;  %v2993_v21 = vmul.f32 %v5154_v63, %v6049_v19 }
 0x2d8   : > { %5167 = vrcp.f32 %v2924_v61  ;;  %v2902_v15 = vand.u32 2147483647, %v2894_v3  ;;  %v3002_v36 = vsub.f32 2.0, %v2994_v24  ;;  %v3008_v4 = vmul.f32 %v5148_v10, %v3000_v20 }
 0x2d9   : > { %5169 = vrcp.f32 %v2923_v31  ;;  %v2901_v18 = vand.u32 2147483647, %v2893_v29 }
 0x2da   : > { %v5156_v2 = vpop.eup %5155  ;;  %5171 = vrcp.f32 %v6055_v38  ;;  %v2926_v13 = vadd.f32 1e-08, %v2902_v15  ;;  %v2999_v15 = vsub.f32 2.0, %v2991_v12  ;;  %v3010_v10 = vmul.f32 %v5152_v55, %v3002_v36 }
 0x2db   : > { %v5158_v16 = vpop.eup %5157  ;;  %5173 = vrcp.f32 %v6057_v39  ;;  %v2936_v28 = vmul.f32 %v5156_v2, %v2920_v22  ;;  %v2925_v33 = vadd.f32 1e-08, %v2901_v18  ;;  %v3001_v22 = vsub.f32 2.0, %v2993_v21 }
 0x2dc   : > { %v6172_v7 = vpop.eup %5159  ;;  %v2935_v34 = vmul.f32 %v5158_v16, %v2919_v59  ;;  %5175 = vrcp.f32 %v2926_v13  ;;  %v6505_v59 = vsub.f32 %v6125_v26, %v6098_v62  ;;  %v3007_v23 = vmul.f32 %v5150_v5, %v2999_v15 }
 0x2dd   : > { %v6175_v29 = vpop.eup %5161  ;;  %v2944_v35 = vsub.f32 2.0, %v2936_v28  ;;  %5177 = vrcp.f32 %v2925_v33  ;;  %v2996_v19 = vmul.f32 %v6172_v7, %v6051_v25  ;;  %v3009_v62 = vmul.f32 %v5154_v63, %v3001_v22 }
 0x2de   : > { %v5164_v3 = vpop.eup %5163  ;;  %v2943_v54 = vsub.f32 2.0, %v2935_v34  ;;  %v2995_v12 = vmul.f32 %v6175_v29, %v6053_v37  ;;  %v6507_v55 = vsub.f32 %v6137_v32, %v6106_v6 }
 0x2df   : > { %v5166_v47 = vpop.eup %5165  ;;  %v2952_v46 = vmul.f32 %v5156_v2, %v2944_v35  ;;  %v2938_v53 = vmul.f32 %v5164_v3, %v2922_v11  ;;  %v6506_v11 = vsub.f32 %v6133_v30, %v6102_v1 }
 0x2e0   : > { %v2951_v18 = vmul.f32 %v5158_v16, %v2943_v54  ;;  %v2937_v27 = vmul.f32 %v5166_v47, %v2921_v57 }
 0x2e1   : > { %v2960_v8 = vmul.f32 %v2952_v46, %v6505_v59  ;;  %v2946_v28 = vsub.f32 2.0, %v2938_v53 }
 0x2e2   : > { %v5168_v52 = vpop.eup %5167  ;;  %v2945_v24 = vsub.f32 2.0, %v2937_v27  ;;  %v2959_v54 = vmul.f32 %v2951_v18, %v6506_v11  ;;  %v3004_v27 = vsub.f32 2.0, %v2996_v19 }
 0x2e3   : > { %v5170_v57 = vpop.eup %5169  ;;  %v2968_v2 = vmul.f32 %v6059_v40, %v2960_v8  ;;  %v2954_v25 = vmul.f32 %v5164_v3, %v2946_v28  ;;  %v2940_v16 = vmul.f32 %v5168_v52, %v2924_v61  ;;  %v3003_v61 = vsub.f32 2.0, %v2995_v12  ;;  %v6514_v12 = vld [vmem:[#allocation27_spill] sm:$0xff] }
 0x2e4   : > { %v5172_v21 = vpop.eup %5171  ;;  %v2953_v46 = vmul.f32 %v5166_v47, %v2945_v24  ;;  %v2939_v53 = vmul.f32 %v5170_v57, %v2923_v31  ;;  %v2967_v26 = vmul.f32 %v2959_v54, %v6061_v41  ;;  %4810 = vmatprep.mubr.msk.f32.mxu0 %vm611_vm0, %v2959_v54  ;;  %v6508_v47 = vsub.f32 %v6141_v56, %v6110_v9  ;;  %v6515_v24 = vld [vmem:[#allocation26_spill] sm:$0xff] }
 0x2e5   : > { %v5174_v37 = vpop.eup %5173  ;;  %v2948_v5 = vsub.f32 2.0, %v2940_v16  ;;  %4811 = vmatmul.mubr.msk.f32.vlgmr.msra.gmra.mrb[48].mxu0 %vm611_vm0, %v2960_v8  ;;  %v2962_v1 = vmul.f32 %v2954_v25, %v6507_v55  ;;  %v2976_v40 = vsub.f32 %v6075_v48, %v2968_v2  ;;  %v2998_v22 = vmul.f32 %v5172_v21, %v6055_v38  ;;  %v6517_v54 = vld [vmem:[#allocation22_spill] sm:$0xff]  ;;  %v6519_v25 = vld [vmem:[#allocation20_spill] sm:$0xff] }
 0x2e6   : > { %v5176_v30 = vpop.eup %5175  ;;  %v2947_v63 = vsub.f32 2.0, %v2939_v53  ;;  %v2961_v41 = vmul.f32 %v2953_v46, %v6508_v47  ;;  %v2975_v31 = vsub.f32 %v6077_v49, %v2967_v26  ;;  %v6509_v49 = vsub.f32 %v6145_v58, %v6114_v14  ;;  %v6520_v46 = vld [vmem:[#allocation23_spill] sm:$0xff]  ;;  %v6521_v26 = vld [vmem:[#allocation24_spill] sm:$0xff] }
 0x2e7   : > { %v5178_v34 = vpop.eup %5177  ;;  %v2956_v20 = vmul.f32 %v5168_v52, %v2948_v5  ;;  %v2942_v35 = vmul.f32 %v5176_v30, %v2926_v13  ;;  %v2970_v3 = vmul.f32 %v6063_v42, %v2962_v1  ;;  %v3016_v15 = vmul.f32 %v3008_v4, %v2976_v40 }
 0x2e8   : > { %v2955_v36 = vmul.f32 %v5170_v57, %v2947_v63  ;;  %v2941_v6 = vmul.f32 %v5178_v34, %v2925_v33  ;;  %v2969_v32 = vmul.f32 %v2961_v41, %v6065_v43  ;;  %4813 = vmatprep.mubr.msk.f32.mxu0 %vm611_vm0, %v2961_v41  ;;  %v3015_v48 = vmul.f32 %v3007_v23, %v2975_v31  ;;  %v6253_v63 = vld [vmem:[%s6522_s4 + $0x8] sm:$0xff]  ;;  %v3220_v41 = vld [vmem:[%s6522_s4 + $0x10] sm:$0xff] }
 0x2e9   : > { %v2950_v18 = vsub.f32 2.0, %v2942_v35  ;;  %4814 = vmatmul.mubr.msk.f32.gmra.mrb[50].mxu0 %vm611_vm0, %v2962_v1  ;;  %v2964_v52 = vmul.f32 %v2956_v20, %v6509_v49  ;;  %v2978_v9 = vsub.f32 %v6079_v50, %v2970_v3  ;;  %v2997_v42 = vmul.f32 %v5174_v37, %v6057_v39  ;;  %v3221_v20 = vld [vmem:[%s6522_s4 + $0x18] sm:$0xff] }
 0x2ea   : > { %v2949_v56 = vsub.f32 2.0, %v2941_v6  ;;  %v6510_v43 = vsub.f32 %v6149_v60, %v6118_v17  ;;  %v2977_v23 = vsub.f32 %v6081_v51, %v2969_v32  ;;  %v3012_v50 = vmul.f32 %v6172_v7, %v3004_v27  ;;  %v6511_v17 = vld [vmem:[#allocation25_spill] sm:$0xff] }
 0x2eb   : > { %v2958_v13 = vmul.f32 %v5176_v30, %v2950_v18  ;;  %v2972_v38 = vmul.f32 %v6067_v44, %v2964_v52  ;;  %v3018_v33 = vmul.f32 %v3010_v10, %v2978_v9  ;;  %v3006_v39 = vsub.f32 2.0, %v2998_v22  ;;  %v6513_v51 = vld [vmem:[#allocation21_spill] sm:$0xff]  ;;  %v6518_v10 = vld [vmem:[#allocation19_spill] sm:$0xff] }
 0x2ec   : > { %v2963_v4 = vmul.f32 %v2955_v36, %v6510_v43  ;;  %v2957_v19 = vmul.f32 %v5178_v34, %v2949_v56  ;;  %v3017_v14 = vmul.f32 %v3009_v62, %v2977_v23  ;;  %v6512_v58 = vsub.f32 %v6153_v0, %v6511_v17 }
 0x2ed   : > { %v2980_v8 = vsub.f32 %v6513_v51, %v2972_v38  ;;  %v3011_v44 = vmul.f32 %v6175_v29, %v3003_v61  ;;  %v3005_v28 = vsub.f32 2.0, %v2997_v42  ;;  %v3014_v62 = vmul.f32 %v5172_v21, %v3006_v39  ;;  %v6244_v21 = vld [vmem:[%s6522_s4] sm:$0xff]  ;;  %v3917_v51 = vld [vmem:[%s5782_s16 + $0x18] sm:$0xff] }
 0x2ee   : > { %v2971_v59 = vmul.f32 %v2963_v4, %v6069_v45  ;;  %4816 = vmatprep.mubr.msk.f32.mxu0 %vm611_vm0, %v2963_v4  ;;  %v2966_v60 = vmul.f32 %v2958_v13, %v6512_v58  ;;  %v6516_v45 = vsub.f32 %v6514_v12, %v6515_v24  ;;  %4838 = vmatprep.mubr.msk.f32.mxu1 %vm611_vm0, %v6244_v21  ;;  %v3914_v39 = vld [vmem:[%s5782_s16] sm:$0xff]  ;;  %v3916_v12 = vld [vmem:[%s5782_s16 + $0x10] sm:$0xff] }
 0x2ef   : > { %4817 = vmatmul.mubr.msk.f32.gmra.mrb[52].mxu0 %vm611_vm0, %v2964_v52  ;;  %v3020_v2 = vmul.f32 %v3012_v50, %v2980_v8  ;;  %v3013_v53 = vmul.f32 %v5174_v37, %v3005_v28 }
 0x2f0   : > { %v2965_v11 = vmul.f32 %v2957_v19, %v6516_v45  ;;  %v2979_v57 = vsub.f32 %v6517_v54, %v2971_v59  ;;  %v2974_v7 = vmul.f32 %v6518_v10, %v2966_v60 }
 0x2f2   : > { %v2973_v16 = vmul.f32 %v2965_v11, %v6519_v25  ;;  %4819 = vmatprep.mubr.msk.f32.mxu0 %vm611_vm0, %v2965_v11  ;;  %v3019_v0 = vmul.f32 %v3011_v44, %v2979_v57  ;;  %v2982_v29 = vsub.f32 %v6520_v46, %v2974_v7  ;;  %v3922_v46 = vld [vmem:[%s5782_s16 + $0x40] sm:$0xff] }
 0x2f3   : > { %4820 = vmatmul.mubr.msk.f32.gmra.mrb[54].mxu0 %vm611_vm0, %v2966_v60 }
 0x2f4   : > { %4822 = vmatprep.mubr.msk.f32.mxu0 %vm611_vm0, %v3015_v48  ;;  %v2981_v27 = vsub.f32 %v6521_v26, %v2973_v16  ;;  %v3022_v5 = vmul.f32 %v3014_v62, %v2982_v29  ;;  %v3923_v62 = vld [vmem:[%s5782_s16 + $0x48] sm:$0xff] }
 0x2f6   : > { %v3021_v55 = vmul.f32 %v3013_v53, %v2981_v27 }
 0x2f7   : > { %4823 = vmatmul.mubr.msk.f32.gmra.mrb[56].mxu0 %vm611_vm0, %v3016_v15 }
 0x2f8   : > { %4825 = vmatprep.mubr.msk.f32.mxu0 %vm611_vm0, %v3017_v14  ;;  %v3915_v14 = vld [vmem:[%s5782_s16 + $0x8] sm:$0xff] }
 0x2fb   : > { %4826 = vmatmul.mubr.msk.f32.gmra.mrb[58].mxu0 %vm611_vm0, %v3018_v33 }
 0x2fc   : > { %4828 = vmatprep.mubr.msk.f32.mxu0 %vm611_vm0, %v3019_v0 }
 0x2ff   : > { %4829 = vmatmul.mubr.msk.f32.gmra.mrb[60].mxu0 %vm611_vm0, %v3020_v2 }
 0x300   : > { %4831 = vmatprep.mubr.msk.f32.mxu0 %vm611_vm0, %v3021_v55 }
 0x303   : > { %4832 = vmatmul.mubr.msk.f32.gmra.mrb[62].mxu0 %vm611_vm0, %v3022_v5  ;;  %v3925_v5 = vld [vmem:[%s5782_s16 + $0x58] sm:$0xff] }
 0x304   : > { %4878 = vmatprep.mubr.msk.f32.mxu0 %vm611_vm0, %v6244_v21 }
 0x3b8   : > { %v4812_v37 = vpop.f32.mrb[48].mxu0 }
 0x3b9   : > { %v3139_v1 = vpop.f32.mrb[49].mxu0 }
 0x3ba   : > { %v5018_v40 = vpack.c.bf16 %v4812_v37, %v3139_v1 }
 0x3bc   : > { %v4815_v30 = vpop.f32.mrb[50].mxu0  ;;  %5019 = vmatprep.subr.bf16.mxu1 %v5018_v40 }
 0x3bd   : > { %v3149_v61 = vpop.f32.mrb[51].mxu0  ;;  %5021 = vmatpush3.bf16.msra.mxu1 %v5018_v40  ;;  %v3919_v40 = vld [vmem:[%s5782_s16 + $0x28] sm:$0xff] }
 0x3be   : > { %v5022_v47 = vpack.c.bf16 %v4815_v30, %v3149_v61 }
 0x3c0   : > { %4839 = vmatmul.mubr.msk.f32.vlgmr.msra.gmra.mrb[48].mxu1 %vm611_vm0, %v6253_v63  ;;  %5023 = vmatprep.subr.bf16.mxu1 %v5022_v47 }
 0x3c1   : > { %5025 = vmatpush3.bf16.msra.mxu1 %v5022_v47  ;;  %4841 = vmatprep.mubr.msk.f32.mxu1 %vm611_vm0, %v3220_v41 }
 0x3c2   : > { %v4818_v31 = vpop.f32.mrb[52].mxu0 }
 0x3c3   : > { %v3159_v34 = vpop.f32.mrb[53].mxu0 }
 0x3c4   : > { %v5026_v35 = vpack.c.bf16 %v4818_v31, %v3159_v34  ;;  %4842 = vmatmul.mubr.msk.f32.gmra.mrb[50].mxu1 %vm611_vm0, %v3221_v20 }
 0x3c5   : > { %4848 = vmatprep.mubr.msk.f32.mxu1 %vm611_vm0, %v6244_v21 }
 0x3c6   : > { %v4821_v3 = vpop.f32.mrb[54].mxu0  ;;  %5027 = vmatprep.subr.bf16.mxu1 %v5026_v35 }
 0x3c7   : > { %v3169_v15 = vpop.f32.mrb[55].mxu0 }
 0x3c8   : > { %v5030_v36 = vpack.c.bf16 %v4821_v3, %v3169_v15  ;;  %4849 = vmatmul.mubr.msk.f32.vlgmr.msra.gmra.mrb[52].mxu1 %vm611_vm0, %v6253_v63 }
 0x3c9   : > { %5029 = vmatpush3.bf16.msra.mxu1 %v5026_v35  ;;  %4851 = vmatprep.mubr.msk.f32.mxu1 %vm611_vm0, %v3220_v41 }
 0x3ca   : > { %v4824_v6 = vpop.f32.mrb[56].mxu0  ;;  %5031 = vmatprep.subr.bf16.mxu1 %v5030_v36 }
 0x3cb   : > { %v3179_v32 = vpop.f32.mrb[57].mxu0 }
 0x3cc   : > { %v5034_v48 = vpack.c.bf16 %v4824_v6, %v3179_v32  ;;  %4852 = vmatmul.mubr.msk.f32.gmra.mrb[54].mxu1 %vm611_vm0, %v3221_v20 }
 0x3cd   : > { %4858 = vmatprep.mubr.msk.f32.mxu1 %vm611_vm0, %v6244_v21 }
 0x3ce   : > { %v4827_v22 = vpop.f32.mrb[58].mxu0  ;;  %5035 = vmatprep.subr.bf16.mxu0 %v5034_v48 }
 0x3cf   : > { %v3189_v18 = vpop.f32.mrb[59].mxu0  ;;  %5037 = vmatpush3.bf16.msra.mxu0 %v5034_v48  ;;  %v3920_v48 = vld [vmem:[%s5782_s16 + $0x30] sm:$0xff] }
 0x3d0   : > { %v5038_v49 = vpack.c.bf16 %v4827_v22, %v3189_v18  ;;  %4859 = vmatmul.mubr.msk.f32.vlgmr.msra.gmra.mrb[56].mxu1 %vm611_vm0, %v6253_v63 }
 0x3d1   : > { %5033 = vmatpush3.bf16.msra.mxu1 %v5030_v36  ;;  %4861 = vmatprep.mubr.msk.f32.mxu1 %vm611_vm0, %v3220_v41  ;;  %v3921_v36 = vld [vmem:[%s5782_s16 + $0x38] sm:$0xff] }
 0x3d2   : > { %v4830_v52 = vpop.f32.mrb[60].mxu0  ;;  %4879 = vmatmul.mubr.msk.f32.vlgmr.msra.gmra.mrb[64].mxu0 %vm611_vm0, %v6253_v63  ;;  %5039 = vmatprep.subr.bf16.mxu1 %v5038_v49 }
 0x3d3   : > { %v3199_v9 = vpop.f32.mrb[61].mxu0  ;;  %4881 = vmatprep.mubr.msk.f32.mxu0 %vm611_vm0, %v3220_v41 }
 0x3d4   : > { %v5042_v42 = vpack.c.bf16 %v4830_v52, %v3199_v9  ;;  %4862 = vmatmul.mubr.msk.f32.gmra.mrb[58].mxu1 %vm611_vm0, %v3221_v20 }
 0x3d5   : > { %4868 = vmatprep.mubr.msk.f32.mxu1 %vm611_vm0, %v6244_v21 }
 0x3d6   : > { %v4833_v56 = vpop.f32.mrb[62].mxu0  ;;  %4882 = vmatmul.mubr.msk.f32.gmra.mrb[66].mxu0 %vm611_vm0, %v3221_v20  ;;  %5043 = vmatprep.subr.bf16.mxu0 %v5042_v42 }
 0x3d7   : > { %v3209_v43 = vpop.f32.mrb[63].mxu0  ;;  %5045 = vmatpush3.bf16.msra.mxu0 %v5042_v42  ;;  %4898 = vmatprep.mubr.msk.f32.mxu0 %vm611_vm0, %v6244_v21  ;;  %v3927_v42 = vld [vmem:[%s5782_s16 + $0x68] sm:$0xff] }
 0x3d8   : > { %v5046_v4 = vpack.c.bf16 %v4833_v56, %v3209_v43  ;;  %4869 = vmatmul.mubr.msk.f32.vlgmr.msra.gmra.mrb[60].mxu1 %vm611_vm0, %v6253_v63  ;;  %v3926_v43 = vld [vmem:[%s5782_s16 + $0x60] sm:$0xff] }
 0x3d9   : > { %5041 = vmatpush3.bf16.msra.mxu1 %v5038_v49  ;;  %4871 = vmatprep.mubr.msk.f32.mxu1 %vm611_vm0, %v3220_v41 }
 0x3da   : > { %5047 = vmatprep.subr.bf16.mxu1 %v5046_v4  ;;  %4899 = vmatmul.mubr.msk.f32.vlgmr.msra.gmra.mrb[68].mxu0 %vm611_vm0, %v6253_v63 }
 0x3db   : > { %4901 = vmatprep.mubr.msk.f32.mxu0 %vm611_vm0, %v3220_v41 }
 0x3dc   : > { %4872 = vmatmul.mubr.msk.f32.gmra.mrb[62].mxu1 %vm611_vm0, %v3221_v20 }
 0x3dd   : > { %4888 = vmatprep.mubr.msk.f32.mxu1 %vm611_vm0, %v6244_v21 }
 0x3de   : > { %4902 = vmatmul.mubr.msk.f32.gmra.mrb[70].mxu0 %vm611_vm0, %v3221_v20 }
 0x3e0   : > { %4889 = vmatmul.mubr.msk.f32.vlgmr.msra.gmra.mrb[64].mxu1 %vm611_vm0, %v6253_v63 }
 0x3e1   : > { %5049 = vmatpush3.bf16.msra.mxu1 %v5046_v4  ;;  %4891 = vmatprep.mubr.msk.f32.mxu1 %vm611_vm0, %v3220_v41 }
 0x3e4   : > { %4892 = vmatmul.mubr.msk.f32.gmra.mrb[66].mxu1 %vm611_vm0, %v3221_v20 }
 0x3e5   : > { %4908 = vmatprep.mubr.msk.f32.mxu1 %vm611_vm0, %v6244_v21  ;;  %v3924_v21 = vld [vmem:[%s5782_s16 + $0x50] sm:$0xff] }
 0x3e8   : > { %4909 = vmatmul.mubr.msk.f32.vlgmr.msra.gmra.mrb[68].mxu1 %vm611_vm0, %v6253_v63  ;;  %v3918_v63 = vld [vmem:[%s5782_s16 + $0x20] sm:$0xff] }
 0x3e9   : > { %4911 = vmatprep.mubr.msk.f32.mxu1 %vm611_vm0, %v3220_v41 }
 0x3ec   : > { %4912 = vmatmul.mubr.msk.f32.gmra.mrb[70].mxu1 %vm611_vm0, %v3221_v20 }
 0x493   : > { %v4840_v23 = vpop.f32.mrb[48].mxu1 }
 0x494   : > { %v3300_v13 = vpop.f32.mrb[49].mxu1  ;;  %v3931_v58 = vmul.f32 %v4840_v23, %v3915_v14  ;;  %v3928_v14 = vld [vmem:[%s5782_s16 + $0x70] sm:$0xff] }
 0x495   : > { %v3930_v60 = vmul.f32 %v3914_v39, %v3300_v13 }
 0x497   : > { %v4843_v38 = vpop.f32.mrb[50].mxu1 }
 0x498   : > { %v3310_v33 = vpop.f32.mrb[51].mxu1  ;;  %v3933_v54 = vmul.f32 %v4843_v38, %v3917_v51 }
 0x499   : > { %v3932_v57 = vmul.f32 %v3916_v12, %v3310_v33 }
 0x49b   : > { %v4850_v19 = vpop.f32.mrb[52].mxu1 }
 0x49c   : > { %v3385_v59 = vpop.f32.mrb[53].mxu1  ;;  %v3935_v20 = vmul.f32 %v4850_v19, %v3919_v40  ;;  %v3929_v19 = vld [vmem:[%s5782_s16 + $0x78] sm:$0xff] }
 0x49d   : > { %v3934_v15 = vmul.f32 %v3918_v63, %v3385_v59 }
 0x49f   : > { %v4853_v50 = vpop.f32.mrb[54].mxu1 }
 0x4a0   : > { %v3395_v17 = vpop.f32.mrb[55].mxu1  ;;  %v3937_v52 = vmul.f32 %v4853_v50, %v3921_v36 }
 0x4a1   : > { %v3936_v9 = vmul.f32 %v3920_v48, %v3395_v17 }
 0x4a3   : > { %v4860_v44 = vpop.f32.mrb[56].mxu1 }
 0x4a4   : > { %v3470_v45 = vpop.f32.mrb[57].mxu1  ;;  %v3939_v53 = vmul.f32 %v4860_v44, %v3923_v62 }
 0x4a5   : > { %v4880_v8 = vpop.f32.mrb[64].mxu0  ;;  %v3938_v27 = vmul.f32 %v3922_v46, %v3470_v45 }
 0x4a6   : > { %v3947_v28 = vadd.f32 %v4880_v8, %v3931_v58  ;;  %v3640_v24 = vpop.f32.mrb[65].mxu0 }
 0x4a7   : > { %v3946_v11 = vadd.f32 %v3930_v60, %v3640_v24  ;;  %v4863_v7 = vpop.f32.mrb[58].mxu1 }
 0x4a8   : > { %3964 = vst.msk [vmem:[%s6311_s17 + $0x8] sm:$0xff] %vm3962_vm1, %v3947_v28  ;;  %v3480_v16 = vpop.f32.mrb[59].mxu1  ;;  %v3941_v47 = vmul.f32 %v4863_v7, %v3925_v5 }
 0x4a9   : > { %3963 = vst.msk [vmem:[%s6311_s17] sm:$0xff] %vm3962_vm1, %v3946_v11  ;;  %v4883_v10 = vpop.f32.mrb[66].mxu0  ;;  %v3940_v31 = vmul.f32 %v3924_v21, %v3480_v16 }
 0x4aa   : > { %v3949_v2 = vadd.f32 %v4883_v10, %v3933_v54  ;;  %v3650_v25 = vpop.f32.mrb[67].mxu0 }
 0x4ab   : > { %v3948_v0 = vadd.f32 %v3932_v57, %v3650_v25  ;;  %v4870_v29 = vpop.f32.mrb[60].mxu1 }
 0x4ac   : > { %3966 = vst.msk [vmem:[%s6311_s17 + $0x18] sm:$0xff] %vm3962_vm1, %v3949_v2  ;;  %v3555_v26 = vpop.f32.mrb[61].mxu1  ;;  %v3943_v38 = vmul.f32 %v4870_v29, %v3927_v42 }
 0x4ad   : > { %3965 = vst.msk [vmem:[%s6311_s17 + $0x10] sm:$0xff] %vm3962_vm1, %v3948_v0  ;;  %v4900_v55 = vpop.f32.mrb[68].mxu0  ;;  %v3942_v33 = vmul.f32 %v3926_v43, %v3555_v26 }
 0x4ae   : > { %v3955_v37 = vadd.f32 %v4900_v55, %v3939_v53  ;;  %v3810_v1 = vpop.f32.mrb[69].mxu0 }
 0x4af   : > { %v4873_v30 = vpop.f32.mrb[62].mxu1  ;;  %v3954_v61 = vadd.f32 %v3938_v27, %v3810_v1 }
 0x4b0   : > { %3972 = vst.msk [vmem:[%s6311_s17 + $0x48] sm:$0xff] %vm3962_vm1, %v3955_v37  ;;  %v3565_v41 = vpop.f32.mrb[63].mxu1  ;;  %v3945_v58 = vmul.f32 %v4873_v30, %v3929_v19 }
 0x4b1   : > { %3971 = vst.msk [vmem:[%s6311_s17 + $0x40] sm:$0xff] %vm3962_vm1, %v3954_v61  ;;  %v4903_v34 = vpop.f32.mrb[70].mxu0  ;;  %v3944_v60 = vmul.f32 %v3928_v14, %v3565_v41 }
 0x4b2   : > { %v3957_v35 = vadd.f32 %v4903_v34, %v3941_v47  ;;  %v3820_v3 = vpop.f32.mrb[71].mxu0 }
 0x4b3   : > { %v4890_v6 = vpop.f32.mrb[64].mxu1  ;;  %v3956_v32 = vadd.f32 %v3940_v31, %v3820_v3 }
 0x4b4   : > { %v3951_v22 = vadd.f32 %v4890_v6, %v3935_v20  ;;  %v3725_v18 = vpop.f32.mrb[65].mxu1  ;;  %3974 = vst.msk [vmem:[%s6311_s17 + $0x58] sm:$0xff] %vm3962_vm1, %v3957_v35 }
 0x4b5   : > { %v3950_v49 = vadd.f32 %v3934_v15, %v3725_v18  ;;  %3973 = vst.msk [vmem:[%s6311_s17 + $0x50] sm:$0xff] %vm3962_vm1, %v3956_v32 }
 0x4b6   : > { %3968 = vst.msk [vmem:[%s6311_s17 + $0x28] sm:$0xff] %vm3962_vm1, %v3951_v22 }
 0x4b7   : > { %3967 = vst.msk [vmem:[%s6311_s17 + $0x20] sm:$0xff] %vm3962_vm1, %v3950_v49  ;;  %v4893_v56 = vpop.f32.mrb[66].mxu1 }
 0x4b8   : > { %v3953_v4 = vadd.f32 %v4893_v56, %v3937_v52  ;;  %v3735_v23 = vpop.f32.mrb[67].mxu1 }
 0x4b9   : > { %v3952_v13 = vadd.f32 %v3936_v9, %v3735_v23 }
 0x4ba   : > { %3970 = vst.msk [vmem:[%s6311_s17 + $0x38] sm:$0xff] %vm3962_vm1, %v3953_v4 }
 0x4bb   : > { %3969 = vst.msk [vmem:[%s6311_s17 + $0x30] sm:$0xff] %vm3962_vm1, %v3952_v13  ;;  %v4910_v59 = vpop.f32.mrb[68].mxu1 }
 0x4bc   : > { %v3959_v50 = vadd.f32 %v4910_v59, %v3943_v38  ;;  %v3895_v39 = vpop.f32.mrb[69].mxu1 }
 0x4bd   : > { %v3958_v17 = vadd.f32 %v3942_v33, %v3895_v39 }
 0x4be   : > { %3976 = vst.msk [vmem:[%s6311_s17 + $0x68] sm:$0xff] %vm3962_vm1, %v3959_v50 }
 0x4bf   : > { %3975 = vst.msk [vmem:[%s6311_s17 + $0x60] sm:$0xff] %vm3962_vm1, %v3958_v17  ;;  %v4913_v51 = vpop.f32.mrb[70].mxu1 }
 0x4c0   : > { %v3961_v8 = vadd.f32 %v4913_v51, %v3945_v58  ;;  %v3905_v44 = vpop.f32.mrb[71].mxu1 }
 0x4c1   : > { %v3960_v28 = vadd.f32 %v3944_v60, %v3905_v44 }
 0x4c2   : > { %3978 = vst.msk [vmem:[%s6311_s17 + $0x78] sm:$0xff] %vm3962_vm1, %v3961_v8 }
 0x4c3   : > { %3977 = vst.msk [vmem:[%s6311_s17 + $0x70] sm:$0xff] %vm3962_vm1, %v3960_v28 }
 0x4c4   : > { %5338 = shalt.err (!%p5335_p8)
}
 0x4c5   : > { %s5339_s25 = scalar_lea.hbm %s6358_s9, 2048  ;;  %s5343_s23 = scalar_lea.hbm %s6524_s28, 4096 }
 0x4c6   : > { %p5340_p5 = scmp.ne.s32.totalorder %s6358_s9, %s5339_s25  ;;  %p5344_p10 = scmp.lt.u32.totalorder %s6358_s9, %s6524_s28 }
 0x4c7   : > { %p5345_p12 = scmp.lt.u32.totalorder %s5343_s23, %s5339_s25  ;;  %p5347_p4 = scmp.lt.u32.totalorder %s5339_s25, %s6358_s9 }
 0x4c8   : > { %p5341_p9 = pnand %p5340_p5, %p6525_p0 }
 0x4c9   : > { %p5346_p1 = por %p5345_p12, %p5344_p10 }
 0x4ca   : > { %p5342_p3 = pneg %p5341_p9 }
 0x4cb   : > { %p5348_p7 = por %p5347_p4, %p5346_p1 }
 0x4cd   : > { %p5349_p2 = pnand %p5348_p7, %p5342_p3 }
 0x4cf   : > { %5352 = shalt.err (!%p5349_p2)
}
 0x4d0   : > { %s5425_s30 = smov 128   ;;  %s5426_s29 = smov 8  }
 0x4d1   : > { %5064 = dma.vmem_to_hbm [thread:$0]  (%p6525_p0), %s6360_s6, 2048, %s6358_s9, %s3980_s12, %s5425_s30, %s5425_s30, %s5426_s29  }
 0x4d2 PF: > { %s6526_s16 = sld [smem:[#allocation16_spill]]  ;;  %s6527_s18 = sld [smem:[#allocation18_spill]] }
 0x4d3   : > { %p6529_p6 = scmp.ge.s32.totalorder %s5415_s14, 2 }
 0x4d8   : > { %s4011_s20 = sand.u32 1, %s6526_s16   ;;  %p6528_p13 = scmp.ne.s32.totalorder %s6527_s18, 0 }
 0x4d9   : > { %s4012_s22 = scalar_lea.sflag [#allocation4], %s4011_s20 }
 0x4da   : > { %p5084_p11 = pnand %p6529_p6, %p6528_p13 }
 0x4dc   : > { %5390 = dma.done.wait (!%p5084_p11), %s4012_s22, 2048  }
 0x4dd   : > { %5392 = vsyncadd (!%p5084_p11), %s4012_s22, 4294965248  ;;  %s29_s14 = sadd.s32 1, %s5415_s14   ;;  %s6530_s30 = smov %s5399_s10 }
 0x4de   : > { %p26_p8 = scmp.ge.s32.totalorder %s29_s14, 4   ;;  %s6531_s10 = smov %s5403_s11 }
 0x4df   : > { %s6532_s11 = smov %s5613_s8  ;;  %s6533_s12 = smov %s5411_s13 }
 0x4e0   : > { %s6534_s13 = smov %s6536_s26  ;;  %28 = sbr.rel (!%p26_p8) target bundleno = 17 (0x11), region = 136 }
 0x4e7   :  { %4017 = vsyncpa [#allocation3], 1 }
 0x4e8   :  { %4019 = vsyncpa [#allocation3 + $0x1], 1 }
 0x4e9   :  { %4020 = vsyncpa [#allocation6], 1 }
 0x4ea   :  { %4022 = vsyncpa [#allocation6 + $0x1], 1 }
 0x4eb   :  { %4023 = vsyncpa [#allocation9], 1 }
 0x4ec   :  { %4024 = vsyncpa [#allocation4], 1 }
 0x4ed   :  { %4026 = vsyncpa [#allocation4 + $0x1], 1 }

</bundles_post_ra>
